<compile_context>
chip_gen: v7x
topology: tpu7x:2x2x1
jax: 0.10.0
libtpu: 0.0.40
codegen_flags: <defaults>
</compile_context>

<pallas_src>
import math

import jax
import jax.numpy as jnp
import numpy as np
from jax import lax
from jax.experimental import pallas as pl
from jax.experimental.pallas import tpu as pltpu

FEATURE_DIM = 384
NUM_HEADS = 4
HEAD_DIM = FEATURE_DIM // NUM_HEADS     # 96
HEAD_PAD = 128                          # lane-aligned per-head width inside the kernel
EP = NUM_HEADS * HEAD_PAD               # 512 (padded width of each of Q / K / V)


def _make_kernel(bb: int, seq: int):
    """Build a kernel processing `bb` batch elements of length `seq` in one grid step."""
    E, H, HP = FEATURE_DIM, NUM_HEADS, HEAD_PAD
    QO, KO, VO = 0, EP, 2 * EP

    def kernel(x_ref, wqkv_ref, bqkv_ref, wo_ref, bo_ref, o_ref):
        # ---- fused QKV projection: one bf16 (bb*S, E) @ (E, 3*EP) matmul, fp32 acc.
        x = x_ref[...].reshape(bb * seq, E)                                  # bf16
        qkv = jnp.dot(x, wqkv_ref[...],
                      preferred_element_type=jnp.float32) + bqkv_ref[...]    # (bb*S, 3*EP) f32
        qkv3 = qkv.reshape(bb, seq, 3 * EP)                                  # free reshape

        # ---- gather per-(batch, head) slabs into (bb*H, S, HP).
        # Static 128-aligned lane slices + leading-axis concat only (no sublane
        # transposes), so the lowering stays simple while downstream ops batch.
        def gather(off, dtype):
            blocks = [qkv3[b:b + 1, :, off + h * HP: off + (h + 1) * HP]
                      for b in range(bb) for h in range(H)]                  # each (1, S, HP)
            return jnp.concatenate(blocks, axis=0).astype(dtype)             # (bb*H, S, HP)

        q = gather(QO, jnp.bfloat16)     # 1/sqrt(head_dim) already folded into Wq/bq
        k = gather(KO, jnp.bfloat16)
        v = gather(VO, jnp.bfloat16)

        # ---- batched scores over the (bb*H) leading dim (one dot_general site).
        s = lax.dot_general(q, k, (((2,), (2,)), ((0,), (0,))),
                            preferred_element_type=jnp.float32)              # (bb*H, S, S)

        # ---- one vectorized, EXACT softmax over the whole slab.
        s = s - jnp.max(s, axis=-1, keepdims=True)
        e = jnp.exp(s)
        p = e / jnp.sum(e, axis=-1, keepdims=True)                           # (bb*H, S, S)

        # ---- batched P@V (full S rows per matmul; no M=1 MXU ops), then mean over
        # queries (exact by linearity since the out-projection is linear).
        o = lax.dot_general(p.astype(jnp.bfloat16), v, (((2,), (1,)), ((0,), (0,))),
                            preferred_element_type=jnp.float32)              # (bb*H, S, HP)
        om = jnp.sum(o, axis=1) * (1.0 / seq)                                # (bb*H, HP)

        # ---- (bb*H, HP) -> (bb, H*HP): static sublane slices + lane concatenation.
        rows = [jnp.concatenate([om[b * H + h: b * H + h + 1, :] for h in range(H)],
                                axis=-1) for b in range(bb)]                 # each (1, 512)
        attn_mean = jnp.concatenate(rows, axis=0)                            # (bb, 512)

        # ---- out-projection on the time-averaged features: (bb, 512) @ (512, E).
        out = jnp.dot(attn_mean.astype(jnp.bfloat16), wo_ref[...],
                      preferred_element_type=jnp.float32) + bo_ref[...]      # (bb, E)
        o_ref[...] = out

    return kernel


def temporal_attention_pallas(frame_features, params):
    """frame_features: (S, B, E) float32 (PyTorch seq-first). Returns (B, E) float32."""
    S, B, E = frame_features.shape
    assert E == FEATURE_DIM
    # Batch-major + bf16 cast in a single tiny wrapper op: keeps every BlockSpec's
    # trailing dims full-sized and feeds the MXU its native dtype.
    x = jnp.transpose(frame_features, (1, 0, 2)).astype(jnp.bfloat16)        # (B, S, E)

    wqkv, bqkv, wo, bo = params["wqkv"], params["bqkv"], params["wo"], params["bo"]

    out = pl.pallas_call(
        _make_kernel(B, S),
        out_shape=jax.ShapeDtypeStruct((B, E), jnp.float32),
        grid_spec=pltpu.PrefetchScalarGridSpec(
            num_scalar_prefetch=0,
            grid=(1,),  # single grid step everywhere: the weight DMA dominates, never duplicate it
            in_specs=[
                pl.BlockSpec((B, S, E), lambda b: (0, 0, 0)),      # x, bf16
                pl.BlockSpec((E, 3 * EP), lambda b: (0, 0)),        # packed QKV weights, bf16
                pl.BlockSpec((1, 3 * EP), lambda b: (0, 0)),        # packed QKV bias, f32
                pl.BlockSpec((EP, E), lambda b: (0, 0)),            # padded out-proj weights, bf16
                pl.BlockSpec((1, E), lambda b: (0, 0)),             # out-proj bias, f32
            ],
            out_specs=pl.BlockSpec((B, E), lambda b: (0, 0)),
        ),
        compiler_params=pltpu.CompilerParams(
            dimension_semantics=("arbitrary",),
            vmem_limit_bytes=32 * 1024 * 1024,  # explicit guard; safe on v5e/v6e/v7x
        ),
    )(x, wqkv, bqkv, wo, bo)

    return out


def prepare_params(in_proj_w, in_proj_b, out_w, out_b):
    """Pack PyTorch-convention MultiheadAttention params into the kernel layout (bf16 weights)."""
    E, H, HD, HP = FEATURE_DIM, NUM_HEADS, HEAD_DIM, HEAD_PAD
    scale = 1.0 / math.sqrt(HD)

    wq, wk, wv = in_proj_w[:E], in_proj_w[E:2 * E], in_proj_w[2 * E:]
    bq, bk, bv = in_proj_b[:E], in_proj_b[E:2 * E], in_proj_b[2 * E:]
    wq = wq * scale          # fold 1/sqrt(head_dim) into the Q projection (weights + bias)
    bq = bq * scale

    def pad_w(w):            # PyTorch weight (out_feat, in_feat) -> (E, H*HP); kernel does x @ result
        wt = w.T.reshape(E, H, HD)
        wt = jnp.pad(wt, ((0, 0), (0, 0), (0, HP - HD)))     # zero columns for padded head dims
        return wt.reshape(E, H * HP)

    def pad_b(b):            # (E,) -> (1, H*HP) with zero padding
        b2 = jnp.pad(b.reshape(H, HD), ((0, 0), (0, HP - HD)))
        return b2.reshape(1, H * HP)

    # Weights stored/DMA'd in bf16 (halves the dominant HBM traffic); biases stay fp32.
    wqkv = jnp.concatenate([pad_w(wq), pad_w(wk), pad_w(wv)], axis=1).astype(jnp.bfloat16)
    bqkv = jnp.concatenate([pad_b(bq), pad_b(bk), pad_b(bv)], axis=1).astype(jnp.float32)

    # out projection: padded-attn @ wo_pad == attn @ out_w.T  (zero rows for padded V dims)
    wo3 = out_w.T.reshape(H, HD, E)
    wo3 = jnp.pad(wo3, ((0, 0), (0, HP - HD), (0, 0)))
    wo_pad = wo3.reshape(H * HP, E).astype(jnp.bfloat16)
    bo = out_b.reshape(1, E).astype(jnp.float32)
    return {"wqkv": wqkv, "bqkv": bqkv, "wo": wo_pad, "bo": bo}


def temporal_attention_ref(x, in_proj_w, in_proj_b, out_w, out_b):
    """Plain-JAX fp32 reference mirroring torch.nn.MultiheadAttention + .mean(dim=0)."""
    S, B, E = x.shape
    qkv = jnp.einsum('sbe,fe->sbf', x, in_proj_w) + in_proj_b               # (S, B, 3E)
    q, k, v = jnp.split(qkv, 3, axis=-1)

    def to_heads(t):
        return t.reshape(S, B, NUM_HEADS, HEAD_DIM).transpose(1, 2, 0, 3)   # (B, H, S, hd)

    qh, kh, vh = to_heads(q), to_heads(k), to_heads(v)
    scores = jnp.einsum('bhsd,bhtd->bhst', qh, kh) / math.sqrt(HEAD_DIM)
    p = jax.nn.softmax(scores, axis=-1)
    o = jnp.einsum('bhst,bhtd->bhsd', p, vh)
    o = o.transpose(2, 0, 1, 3).reshape(S, B, E)
    o = jnp.einsum('sbe,fe->sbf', o, out_w) + out_b
    return o.mean(axis=0)                                                   # (B, E)


def init_raw_params(key):
    """Synthetic init matching nn.MultiheadAttention parameter shapes (nonzero biases)."""
    E = FEATURE_DIM
    k1, k2, k3, k4 = jax.random.split(key, 4)
    lim_in = math.sqrt(6.0 / (E + 3 * E))
    in_proj_w = jax.random.uniform(k1, (3 * E, E), jnp.float32, -lim_in, lim_in)
    in_proj_b = 0.02 * jax.random.normal(k3, (3 * E,), jnp.float32)
    lim_out = 1.0 / math.sqrt(E)
    out_w = jax.random.uniform(k2, (E, E), jnp.float32, -lim_out, lim_out)
    out_b = 0.02 * jax.random.normal(k4, (E,), jnp.float32)
    return in_proj_w, in_proj_b, out_w, out_b


if __name__ == "__main__":
    SEQ, BATCH = 8, 2
    key = jax.random.PRNGKey(0)
    kx, kp = jax.random.split(key)

    frame_features = jax.random.normal(kx, (SEQ, BATCH, FEATURE_DIM), jnp.float32)
    raw = init_raw_params(kp)
    params = prepare_params(*raw)

    out = temporal_attention_pallas(frame_features, params)
    out = jax.block_until_ready(out)

    ref = temporal_attention_ref(frame_features, *raw)
    # Tolerance consistent with bf16 weight/activation storage (~2^-8 relative);
    # softmax normalization itself is exact (no approx reciprocal).
    np.testing.assert_allclose(np.asarray(out), np.asarray(ref), atol=2e-2, rtol=2e-2)

    print("KERNEL_OK")
</pallas_src>

<mosaic_0001>
module attributes {stable_mosaic.version = 11 : i64} {
  func.func @kernel(%arg0: i32, %arg1: memref<2x8x384xbf16, #tpu.memory_space<vmem>>, %arg2: memref<384x1536xbf16, #tpu.memory_space<vmem>>, %arg3: memref<1x1536xf32, #tpu.memory_space<vmem>>, %arg4: memref<512x384xbf16, #tpu.memory_space<vmem>>, %arg5: memref<1x384xf32, #tpu.memory_space<vmem>>, %arg6: memref<2x384xf32, #tpu.memory_space<vmem>>) attributes {dimension_semantics = [#tpu.dimension_semantics<arbitrary>], iteration_bounds = array<i64: 1>, scalar_prefetch = 0 : i64, scratch_operands = 0 : i64, tpu.core_type = #tpu.core_type<tc>, window_params = [{pipeline_mode = #tpu.pipeline_mode<synchronous>, transform_indices = @transform_0, window_bounds = array<i64: 2, 8, 384>}, {pipeline_mode = #tpu.pipeline_mode<synchronous>, transform_indices = @transform_1, window_bounds = array<i64: 384, 1536>}, {pipeline_mode = #tpu.pipeline_mode<synchronous>, transform_indices = @transform_2, window_bounds = array<i64: 1, 1536>}, {pipeline_mode = #tpu.pipeline_mode<synchronous>, transform_indices = @transform_3, window_bounds = array<i64: 512, 384>}, {pipeline_mode = #tpu.pipeline_mode<synchronous>, transform_indices = @transform_4, window_bounds = array<i64: 1, 384>}, {pipeline_mode = #tpu.pipeline_mode<synchronous>, transform_indices = @transform_5, window_bounds = array<i64: 2, 384>}]} {
    %c0 = arith.constant 0 : index
    %c0_0 = arith.constant 0 : index
    %c0_1 = arith.constant 0 : index
    %0 = vector.load %arg1[%c0, %c0_0, %c0_1] : memref<2x8x384xbf16, #tpu.memory_space<vmem>>, vector<2x8x384xbf16>
    %1 = vector.shape_cast %0 : vector<2x8x384xbf16> to vector<16x384xbf16>
    %c0_2 = arith.constant 0 : index
    %c0_3 = arith.constant 0 : index
    %2 = vector.load %arg2[%c0_2, %c0_3] : memref<384x1536xbf16, #tpu.memory_space<vmem>>, vector<384x1536xbf16>
    %cst = arith.constant dense<0.000000e+00> : vector<16x1536xf32>
    %3 = tpu.matmul %1, %2, %cst {dimension_numbers = #tpu.dot_dimension_numbers<[1], [0], [0], [1], [0, 0, 1, 1], [], []>} : vector<16x384xbf16>, vector<384x1536xbf16>, vector<16x1536xf32> -> vector<16x1536xf32>
    %c0_4 = arith.constant 0 : index
    %c0_5 = arith.constant 0 : index
    %4 = vector.load %arg3[%c0_4, %c0_5] : memref<1x1536xf32, #tpu.memory_space<vmem>>, vector<1x1536xf32>
    %5 = vector.broadcast %4 : vector<1x1536xf32> to vector<16x1536xf32>
    %6 = arith.addf %3, %5 : vector<16x1536xf32>
    %7 = vector.shape_cast %6 : vector<16x1536xf32> to vector<2x8x1536xf32>
    %8 = vector.extract_strided_slice %7 {offsets = [0, 0, 0], sizes = [1, 8, 128], strides = [1, 1, 1]} : vector<2x8x1536xf32> to vector<1x8x128xf32>
    %9 = vector.extract_strided_slice %7 {offsets = [0, 0, 128], sizes = [1, 8, 128], strides = [1, 1, 1]} : vector<2x8x1536xf32> to vector<1x8x128xf32>
    %10 = vector.extract_strided_slice %7 {offsets = [0, 0, 256], sizes = [1, 8, 128], strides = [1, 1, 1]} : vector<2x8x1536xf32> to vector<1x8x128xf32>
    %11 = vector.extract_strided_slice %7 {offsets = [0, 0, 384], sizes = [1, 8, 128], strides = [1, 1, 1]} : vector<2x8x1536xf32> to vector<1x8x128xf32>
    %12 = vector.extract_strided_slice %7 {offsets = [1, 0, 0], sizes = [1, 8, 128], strides = [1, 1, 1]} : vector<2x8x1536xf32> to vector<1x8x128xf32>
    %13 = vector.extract_strided_slice %7 {offsets = [1, 0, 128], sizes = [1, 8, 128], strides = [1, 1, 1]} : vector<2x8x1536xf32> to vector<1x8x128xf32>
    %14 = vector.extract_strided_slice %7 {offsets = [1, 0, 256], sizes = [1, 8, 128], strides = [1, 1, 1]} : vector<2x8x1536xf32> to vector<1x8x128xf32>
    %15 = vector.extract_strided_slice %7 {offsets = [1, 0, 384], sizes = [1, 8, 128], strides = [1, 1, 1]} : vector<2x8x1536xf32> to vector<1x8x128xf32>
    %16 = tpu.concatenate %8, %9, %10, %11, %12, %13, %14, %15 in 0 : vector<1x8x128xf32>, vector<1x8x128xf32>, vector<1x8x128xf32>, vector<1x8x128xf32>, vector<1x8x128xf32>, vector<1x8x128xf32>, vector<1x8x128xf32>, vector<1x8x128xf32> -> vector<8x8x128xf32>
    %17 = arith.truncf %16 : vector<8x8x128xf32> to vector<8x8x128xbf16>
    %18 = vector.extract_strided_slice %7 {offsets = [0, 0, 512], sizes = [1, 8, 128], strides = [1, 1, 1]} : vector<2x8x1536xf32> to vector<1x8x128xf32>
    %19 = vector.extract_strided_slice %7 {offsets = [0, 0, 640], sizes = [1, 8, 128], strides = [1, 1, 1]} : vector<2x8x1536xf32> to vector<1x8x128xf32>
    %20 = vector.extract_strided_slice %7 {offsets = [0, 0, 768], sizes = [1, 8, 128], strides = [1, 1, 1]} : vector<2x8x1536xf32> to vector<1x8x128xf32>
    %21 = vector.extract_strided_slice %7 {offsets = [0, 0, 896], sizes = [1, 8, 128], strides = [1, 1, 1]} : vector<2x8x1536xf32> to vector<1x8x128xf32>
    %22 = vector.extract_strided_slice %7 {offsets = [1, 0, 512], sizes = [1, 8, 128], strides = [1, 1, 1]} : vector<2x8x1536xf32> to vector<1x8x128xf32>
    %23 = vector.extract_strided_slice %7 {offsets = [1, 0, 640], sizes = [1, 8, 128], strides = [1, 1, 1]} : vector<2x8x1536xf32> to vector<1x8x128xf32>
    %24 = vector.extract_strided_slice %7 {offsets = [1, 0, 768], sizes = [1, 8, 128], strides = [1, 1, 1]} : vector<2x8x1536xf32> to vector<1x8x128xf32>
    %25 = vector.extract_strided_slice %7 {offsets = [1, 0, 896], sizes = [1, 8, 128], strides = [1, 1, 1]} : vector<2x8x1536xf32> to vector<1x8x128xf32>
    %26 = tpu.concatenate %18, %19, %20, %21, %22, %23, %24, %25 in 0 : vector<1x8x128xf32>, vector<1x8x128xf32>, vector<1x8x128xf32>, vector<1x8x128xf32>, vector<1x8x128xf32>, vector<1x8x128xf32>, vector<1x8x128xf32>, vector<1x8x128xf32> -> vector<8x8x128xf32>
    %27 = arith.truncf %26 : vector<8x8x128xf32> to vector<8x8x128xbf16>
    %28 = vector.extract_strided_slice %7 {offsets = [0, 0, 1024], sizes = [1, 8, 128], strides = [1, 1, 1]} : vector<2x8x1536xf32> to vector<1x8x128xf32>
    %29 = vector.extract_strided_slice %7 {offsets = [0, 0, 1152], sizes = [1, 8, 128], strides = [1, 1, 1]} : vector<2x8x1536xf32> to vector<1x8x128xf32>
    %30 = vector.extract_strided_slice %7 {offsets = [0, 0, 1280], sizes = [1, 8, 128], strides = [1, 1, 1]} : vector<2x8x1536xf32> to vector<1x8x128xf32>
    %31 = vector.extract_strided_slice %7 {offsets = [0, 0, 1408], sizes = [1, 8, 128], strides = [1, 1, 1]} : vector<2x8x1536xf32> to vector<1x8x128xf32>
    %32 = vector.extract_strided_slice %7 {offsets = [1, 0, 1024], sizes = [1, 8, 128], strides = [1, 1, 1]} : vector<2x8x1536xf32> to vector<1x8x128xf32>
    %33 = vector.extract_strided_slice %7 {offsets = [1, 0, 1152], sizes = [1, 8, 128], strides = [1, 1, 1]} : vector<2x8x1536xf32> to vector<1x8x128xf32>
    %34 = vector.extract_strided_slice %7 {offsets = [1, 0, 1280], sizes = [1, 8, 128], strides = [1, 1, 1]} : vector<2x8x1536xf32> to vector<1x8x128xf32>
    %35 = vector.extract_strided_slice %7 {offsets = [1, 0, 1408], sizes = [1, 8, 128], strides = [1, 1, 1]} : vector<2x8x1536xf32> to vector<1x8x128xf32>
    %36 = tpu.concatenate %28, %29, %30, %31, %32, %33, %34, %35 in 0 : vector<1x8x128xf32>, vector<1x8x128xf32>, vector<1x8x128xf32>, vector<1x8x128xf32>, vector<1x8x128xf32>, vector<1x8x128xf32>, vector<1x8x128xf32>, vector<1x8x128xf32> -> vector<8x8x128xf32>
    %37 = arith.truncf %36 : vector<8x8x128xf32> to vector<8x8x128xbf16>
    %cst_6 = arith.constant dense<0.000000e+00> : vector<8x8x8xf32>
    %38 = tpu.matmul %17, %27, %cst_6 {dimension_numbers = #tpu.dot_dimension_numbers<[2], [2], [1], [1], [0, 0, 0, 1, 1, 1], [0], [0]>} : vector<8x8x128xbf16>, vector<8x8x128xbf16>, vector<8x8x8xf32> -> vector<8x8x8xf32>
    %cst_7 = arith.constant dense<0xFF800000> : vector<8x8xf32>
    %39 = vector.multi_reduction <maximumf>, %38, %cst_7 [2] : vector<8x8x8xf32> to vector<8x8xf32>
    %40 = vector.shape_cast %39 : vector<8x8xf32> to vector<8x8x1xf32>
    %41 = vector.broadcast %40 : vector<8x8x1xf32> to vector<8x8x8xf32>
    %42 = arith.subf %38, %41 : vector<8x8x8xf32>
    %43 = math.exp %42 : vector<8x8x8xf32>
    %cst_8 = arith.constant dense<0.000000e+00> : vector<8x8xf32>
    %44 = vector.multi_reduction <add>, %43, %cst_8 [2] : vector<8x8x8xf32> to vector<8x8xf32>
    %45 = vector.shape_cast %44 : vector<8x8xf32> to vector<8x8x1xf32>
    %46 = vector.broadcast %45 : vector<8x8x1xf32> to vector<8x8x8xf32>
    %47 = arith.divf %43, %46 : vector<8x8x8xf32>
    %48 = arith.truncf %47 : vector<8x8x8xf32> to vector<8x8x8xbf16>
    %cst_9 = arith.constant dense<0.000000e+00> : vector<8x8x128xf32>
    %49 = tpu.matmul %48, %37, %cst_9 {dimension_numbers = #tpu.dot_dimension_numbers<[2], [1], [1], [2], [0, 0, 0, 1, 1, 2], [0], [0]>} : vector<8x8x8xbf16>, vector<8x8x128xbf16>, vector<8x8x128xf32> -> vector<8x8x128xf32>
    %cst_10 = arith.constant dense<0.000000e+00> : vector<8x128xf32>
    %50 = vector.multi_reduction <add>, %49, %cst_10 [1] : vector<8x8x128xf32> to vector<8x128xf32>
    %cst_11 = arith.constant 1.250000e-01 : f32
    %51 = vector.broadcast %cst_11 : f32 to vector<8x128xf32>
    %52 = arith.mulf %50, %51 : vector<8x128xf32>
    %53 = vector.extract_strided_slice %52 {offsets = [0, 0], sizes = [1, 128], strides = [1, 1]} : vector<8x128xf32> to vector<1x128xf32>
    %54 = vector.extract_strided_slice %52 {offsets = [1, 0], sizes = [1, 128], strides = [1, 1]} : vector<8x128xf32> to vector<1x128xf32>
    %55 = vector.extract_strided_slice %52 {offsets = [2, 0], sizes = [1, 128], strides = [1, 1]} : vector<8x128xf32> to vector<1x128xf32>
    %56 = vector.extract_strided_slice %52 {offsets = [3, 0], sizes = [1, 128], strides = [1, 1]} : vector<8x128xf32> to vector<1x128xf32>
    %57 = tpu.concatenate %53, %54, %55, %56 in 1 : vector<1x128xf32>, vector<1x128xf32>, vector<1x128xf32>, vector<1x128xf32> -> vector<1x512xf32>
    %58 = vector.extract_strided_slice %52 {offsets = [4, 0], sizes = [1, 128], strides = [1, 1]} : vector<8x128xf32> to vector<1x128xf32>
    %59 = vector.extract_strided_slice %52 {offsets = [5, 0], sizes = [1, 128], strides = [1, 1]} : vector<8x128xf32> to vector<1x128xf32>
    %60 = vector.extract_strided_slice %52 {offsets = [6, 0], sizes = [1, 128], strides = [1, 1]} : vector<8x128xf32> to vector<1x128xf32>
    %61 = vector.extract_strided_slice %52 {offsets = [7, 0], sizes = [1, 128], strides = [1, 1]} : vector<8x128xf32> to vector<1x128xf32>
    %62 = tpu.concatenate %58, %59, %60, %61 in 1 : vector<1x128xf32>, vector<1x128xf32>, vector<1x128xf32>, vector<1x128xf32> -> vector<1x512xf32>
    %63 = tpu.concatenate %57, %62 in 0 : vector<1x512xf32>, vector<1x512xf32> -> vector<2x512xf32>
    %64 = arith.truncf %63 : vector<2x512xf32> to vector<2x512xbf16>
    %c0_12 = arith.constant 0 : index
    %c0_13 = arith.constant 0 : index
    %65 = vector.load %arg4[%c0_12, %c0_13] : memref<512x384xbf16, #tpu.memory_space<vmem>>, vector<512x384xbf16>
    %cst_14 = arith.constant dense<0.000000e+00> : vector<2x384xf32>
    %66 = tpu.matmul %64, %65, %cst_14 {dimension_numbers = #tpu.dot_dimension_numbers<[1], [0], [0], [1], [0, 0, 1, 1], [], []>} : vector<2x512xbf16>, vector<512x384xbf16>, vector<2x384xf32> -> vector<2x384xf32>
    %c0_15 = arith.constant 0 : index
    %c0_16 = arith.constant 0 : index
    %67 = vector.load %arg5[%c0_15, %c0_16] : memref<1x384xf32, #tpu.memory_space<vmem>>, vector<1x384xf32>
    %68 = vector.broadcast %67 : vector<1x384xf32> to vector<2x384xf32>
    %69 = arith.addf %66, %68 : vector<2x384xf32>
    %c0_17 = arith.constant 0 : index
    %c0_18 = arith.constant 0 : index
    %70 = vector.load %arg6[%c0_17, %c0_18] : memref<2x384xf32, #tpu.memory_space<vmem>>, vector<2x384xf32>
    tpu.vector_store %arg6[%c0_17, %c0_18], %69 {strides = array<i32>} : memref<2x384xf32, #tpu.memory_space<vmem>>, vector<2x384xf32>,
    return
  }
  func.func @transform_0(%arg0: i32) -> (i32, i32, i32) {
    %c0_i32 = arith.constant 0 : i32
    %c0_i32_0 = arith.constant 0 : i32
    %c0_i32_1 = arith.constant 0 : i32
    %c0_i32_2 = arith.constant 0 : i32
    return %c0_i32, %c0_i32_0, %c0_i32_1 : i32, i32, i32
  }
  func.func @transform_1(%arg0: i32) -> (i32, i32) {
    %c0_i32 = arith.constant 0 : i32
    %c0_i32_0 = arith.constant 0 : i32
    %c0_i32_1 = arith.constant 0 : i32
    return %c0_i32, %c0_i32_0 : i32, i32
  }
  func.func @transform_2(%arg0: i32) -> (i32, i32) {
    %c0_i32 = arith.constant 0 : i32
    %c0_i32_0 = arith.constant 0 : i32
    %c0_i32_1 = arith.constant 0 : i32
    return %c0_i32, %c0_i32_0 : i32, i32
  }
  func.func @transform_3(%arg0: i32) -> (i32, i32) {
    %c0_i32 = arith.constant 0 : i32
    %c0_i32_0 = arith.constant 0 : i32
    %c0_i32_1 = arith.constant 0 : i32
    return %c0_i32, %c0_i32_0 : i32, i32
  }
  func.func @transform_4(%arg0: i32) -> (i32, i32) {
    %c0_i32 = arith.constant 0 : i32
    %c0_i32_0 = arith.constant 0 : i32
    %c0_i32_1 = arith.constant 0 : i32
    return %c0_i32, %c0_i32_0 : i32, i32
  }
  func.func @transform_5(%arg0: i32) -> (i32, i32) {
    %c0_i32 = arith.constant 0 : i32
    %c0_i32_0 = arith.constant 0 : i32
    %c0_i32_1 = arith.constant 0 : i32
    return %c0_i32, %c0_i32_0 : i32, i32
  }
}

</mosaic_0001>

<bundles_post_ra>
// kernel: tpu_custom_call.1
= control target key start
LH: loop header
LB: loop body
LE: loop exit
PB: predicated region body
PF: predicated region fallthrough
CT: control target
= control target key end

     0   :  { %10 = vsyncpa [#allocation3], 0  ;;  %s5885_s0 = inlined_call_operand.hbm [shape: bf16[2,8,384], index: 0, kind: input, shape index: {}]   ;;  %s5886_s1 = inlined_call_operand.hbm [shape: bf16[384,1536], index: 1, kind: input, shape index: {}]   ;;  %s5887_s2 = inlined_call_operand.hbm [shape: f32[1,1536], index: 2, kind: input, shape index: {}]   ;;  %s5888_s3 = inlined_call_operand.hbm [shape: bf16[512,384], index: 3, kind: input, shape index: {}]   ;;  %s5889_s4 = inlined_call_operand.hbm [shape: f32[1,384], index: 4, kind: input, shape index: {}]   ;;  %s5890_s5 = inlined_call_operand.hbm [shape: f32[2,384], index: 5, kind: output, shape index: {}]  }
   0x1   :  { %11 = vsyncpa [#allocation6], 0 }
   0x2   :  { %12 = vsyncpa [#allocation9], 0 }
   0x3   :  { %13 = vsyncpa [#allocation4], 0  ;;  %s5532_s18 = smov [#allocation5]   ;;  %s5392_s22 = scalar_lea.hbm %s5886_s1, 36864 }
   0x4   :  { %s31_s19 = sshll.u32 %s5532_s18, 4  ;;  %p5393_p0 = scmp.ne.s32.totalorder %s5886_s1, %s5392_s22  ;;  %s32_s19 = int_to_ptr.vmem [resolvable:$true] %s31_s19 }
   0x5   :  { %p5396_p1 = scmp.lt.u32.totalorder %s5392_s22, %s5886_s1 }
   0x7   :  { %p5398_p2 = pnand %p5396_p1, %p5393_p0 }
   0x9   :  { %5401 = shalt.err (!%p5398_p2)
}
   0xa   :  { %s5402_s27 = scalar_lea.vmem %s32_s19, 36864  ;;  %p5407_p4 = scmp.lt.s32.totalorder %s32_s19, %s32_s19 }
   0xb   :  { %p5403_p3 = scmp.ne.s32.totalorder %s32_s19, %s5402_s27  ;;  %p5408_p5 = scmp.lt.s32.totalorder %s5402_s27, %s5402_s27 }
   0xd   :  { %p5409_p6 = por %p5408_p5, %p5407_p4 }
   0xf   :  { %p5410_p7 = pnand %p5409_p6, %p5403_p3 }
  0x11   :  { %5413 = shalt.err (!%p5410_p7)
}
  0x12   :  { %s5533_s28 = smov 768   ;;  %s5534_s29 = smov 48  }
  0x13   :  { %37 = dma.hbm_to_vmem [thread:$0]  %s5886_s1, 36864, %s32_s19, [#allocation6], %s5533_s28, %s5533_s28, %s5534_s29  }
  0x14   :  { %s5535_s7 = smov [#allocation8]   ;;  %s5536_s9 = smov [#allocation2]  }
  0x15   :  { %s53_s8 = sshll.u32 %s5535_s7, 4  ;;  %s19_s10 = sshll.u32 %s5536_s9, 4  ;;  %s54_s8 = int_to_ptr.vmem [resolvable:$true] %s53_s8  ;;  %s20_s10 = int_to_ptr.vmem [resolvable:$true] %s19_s10 }
  0x16   :  { %s5414_s13 = scalar_lea.hbm %s5888_s3, 12288 }
  0x17   :  { %p5415_p8 = scmp.ne.s32.totalorder %s5888_s3, %s5414_s13  ;;  %p5418_p9 = scmp.lt.u32.totalorder %s5414_s13, %s5888_s3 }
  0x19   :  { %p5420_p10 = pnand %p5418_p9, %p5415_p8 }
  0x1b   :  { %5423 = shalt.err (!%p5420_p10)
}
  0x1c   :  { %s5424_s1 = scalar_lea.vmem %s54_s8, 12288  ;;  %p5429_p12 = scmp.lt.s32.totalorder %s54_s8, %s54_s8 }
  0x1d   :  { %p5425_p11 = scmp.ne.s32.totalorder %s54_s8, %s5424_s1  ;;  %p5430_p13 = scmp.lt.s32.totalorder %s5424_s1, %s5424_s1 }
  0x1f   :  { %p5431_p0 = por %p5430_p13, %p5429_p12 }
  0x21   :  { %p5432_p1 = pnand %p5431_p0, %p5425_p11 }
  0x23   :  { %5435 = shalt.err (!%p5432_p1)
}
  0x24   :  { %s5537_s18 = smov 192   ;;  %s5538_s19 = smov 12  }
  0x25   :  { %59 = dma.hbm_to_vmem [thread:$0]  %s5888_s3, 12288, %s54_s8, [#allocation9], %s5537_s18, %s5537_s18, %s5538_s19  }
  0x26   :  { %s5436_s24 = scalar_lea.hbm %s5885_s0, 384 }
  0x27   :  { %p5437_p2 = scmp.ne.s32.totalorder %s5885_s0, %s5436_s24  ;;  %p5440_p3 = scmp.lt.u32.totalorder %s5436_s24, %s5885_s0 }
  0x29   :  { %p5442_p4 = pnand %p5440_p3, %p5437_p2 }
  0x2b   :  { %5445 = shalt.err (!%p5442_p4)
}
  0x2c   :  { %s5446_s29 = scalar_lea.vmem %s20_s10, 384  ;;  %p5451_p6 = scmp.lt.s32.totalorder %s20_s10, %s20_s10 }
  0x2d   :  { %p5447_p5 = scmp.ne.s32.totalorder %s20_s10, %s5446_s29  ;;  %p5452_p7 = scmp.lt.s32.totalorder %s5446_s29, %s5446_s29 }
  0x2f   :  { %p5453_p8 = por %p5452_p7, %p5451_p6 }
  0x31   :  { %p5454_p9 = pnand %p5453_p8, %p5447_p5 }
  0x33   :  { %5457 = shalt.err (!%p5454_p9)
}
  0x34   :  { %25 = dma.hbm_to_vmem [thread:$0]  %s5885_s0, 384, %s20_s10, [#allocation3], %s5537_s18, %s5537_s18, %s5538_s19  }
  0x35   :  { %s5539_s6 = smov [#allocation7]   ;;  %s5540_s8 = smov [#allocation10]  }
  0x36   :  { %s44_s7 = sshll.u32 %s5539_s6, 4  ;;  %s66_s9 = sshll.u32 %s5540_s8, 4  ;;  %s45_s7 = int_to_ptr.vmem [resolvable:$true] %s44_s7  ;;  %s67_s9 = int_to_ptr.vmem [resolvable:$true] %s66_s9 }
  0x37   :  { %s5458_s13 = scalar_lea.hbm %s5887_s2, 192 }
  0x38   :  { %p5459_p10 = scmp.ne.s32.totalorder %s5887_s2, %s5458_s13  ;;  %p5462_p11 = scmp.lt.u32.totalorder %s5458_s13, %s5887_s2 }
  0x3a   :  { %p5464_p12 = pnand %p5462_p11, %p5459_p10 }
  0x3c   :  { %5467 = shalt.err (!%p5464_p12)
}
  0x3d   :  { %s5468_s0 = scalar_lea.vmem %s45_s7, 192  ;;  %p5473_p0 = scmp.lt.s32.totalorder %s45_s7, %s45_s7 }
  0x3e   :  { %p5469_p13 = scmp.ne.s32.totalorder %s45_s7, %s5468_s0  ;;  %p5474_p1 = scmp.lt.s32.totalorder %s5468_s0, %s5468_s0 }
  0x40   :  { %p5475_p2 = por %p5474_p1, %p5473_p0 }
  0x42   :  { %p5476_p3 = pnand %p5475_p2, %p5469_p13 }
  0x44   :  { %5479 = shalt.err (!%p5476_p3)
}
  0x45   :  { %47 = dma.hbm_to_vmem [thread:$0]  %s5887_s2, 192, %s45_s7, [#allocation6]  }
  0x46   :  { %s5480_s20 = scalar_lea.hbm %s5889_s4, 48 }
  0x47   :  { %p5481_p4 = scmp.ne.s32.totalorder %s5889_s4, %s5480_s20  ;;  %p5484_p5 = scmp.lt.u32.totalorder %s5480_s20, %s5889_s4 }
  0x49   :  { %p5486_p6 = pnand %p5484_p5, %p5481_p4 }
  0x4b   :  { %5489 = shalt.err (!%p5486_p6)
}
  0x4c   :  { %s5490_s25 = scalar_lea.vmem %s67_s9, 48  ;;  %s5494_s26 = scalar_lea.vmem %s67_s9, 64 }
  0x4d   :  { %p5491_p7 = scmp.ne.s32.totalorder %s67_s9, %s5490_s25  ;;  %p5495_p8 = scmp.lt.s32.totalorder %s67_s9, %s67_s9 }
  0x4e   :  { %p5496_p9 = scmp.lt.s32.totalorder %s5494_s26, %s5490_s25 }
  0x50   :  { %p5497_p10 = por %p5496_p9, %p5495_p8 }
  0x52   :  { %p5498_p11 = pnand %p5497_p10, %p5491_p7 }
  0x54   :  { %5501 = shalt.err (!%p5498_p11)
}
  0x55   :  { %69 = dma.hbm_to_vmem [thread:$0]  %s5889_s4, 48, %s67_s9, [#allocation9]  }
  0x56   :  { %5524 = dma.done.wait [#allocation3], 384  }
  0x57   :  { %5525 = vsyncadd [#allocation3], 4294966912 }
  0x58   :  { %5526 = dma.done.wait [#allocation6], 37056  }
  0x59   :  { %5527 = vsyncadd [#allocation6], 4294930240 }
  0x5a   :  { %5528 = dma.done.wait [#allocation9], 12336  }
  0x5b   :  { %5529 = vsyncadd [#allocation9], 4294954960  ;;  %v5541_v0 = vmov 0   ;;  %v4793_v1 = vld [vmem:[#allocation5 + $0x4] ss:$48 sps:$4 sm:$0xff]   ;;  %vm5543_vm0 = vmmov 0  }
  0x5c   :  { %1973 = vmatprep.mubr.bf16.mxu1 %v5541_v0  ;;  %v4795_v2 = vld [vmem:[#allocation5 + $0x604] ss:$48 sps:$4 sm:$0xff]   ;;  %1898 = vmatprep.subr.bf16.mxu0 %v4793_v1  ;;  %v4797_v3 = vld [vmem:[#allocation5] ss:$48 sps:$4 sm:$0xff]   ;;  %v4846_v34 = vld [vmem:[#allocation5 + $0xc] ss:$48 sps:$4 sm:$0xff]  }
  0x5d   :  { %v4798_v4 = vld [vmem:[#allocation5 + $0x600] ss:$48 sps:$4 sm:$0xff]   ;;  %1941 = vmatprep.subr.bf16.mxu1 %v4795_v2  ;;  %v4799_v5 = vld [vmem:[#allocation5 + $0x64] ss:$48 sps:$4 sm:$0xff]   ;;  %1899 = vmatpush1.bf16.msra.mxu0 %v4797_v3  ;;  %v4844_v36 = vld [vmem:[#allocation5 + $0x8] ss:$48 sps:$4 sm:$0xff]  }
  0x5e   :  { %1942 = vmatpush1.bf16.msra.mxu1 %v4798_v4  ;;  %v4801_v6 = vld [vmem:[#allocation5 + $0x664] ss:$48 sps:$4 sm:$0xff]   ;;  %v4803_v7 = vld [vmem:[#allocation5 + $0x60] ss:$48 sps:$4 sm:$0xff]   ;;  %1900 = vmatprep.subr.bf16.mxu0 %v4799_v5  ;;  %v4852_v39 = vld [vmem:[#allocation5 + $0x6c] ss:$48 sps:$4 sm:$0xff]  }
  0x5f   :  { %v4804_v8 = vld [vmem:[#allocation5 + $0x660] ss:$48 sps:$4 sm:$0xff]   ;;  %1943 = vmatprep.subr.bf16.mxu1 %v4801_v6  ;;  %v4805_v9 = vld [vmem:[#allocation5 + $0xc4] ss:$48 sps:$4 sm:$0xff]   ;;  %v4850_v40 = vld [vmem:[#allocation5 + $0x68] ss:$48 sps:$4 sm:$0xff]  }
  0x60   :  { %v4807_v10 = vld [vmem:[#allocation5 + $0x6c4] ss:$48 sps:$4 sm:$0xff]   ;;  %v4809_v11 = vld [vmem:[#allocation5 + $0xc0] ss:$48 sps:$4 sm:$0xff]   ;;  %v4858_v43 = vld [vmem:[#allocation5 + $0xcc] ss:$48 sps:$4 sm:$0xff]  }
  0x61   :  { %v4810_v12 = vld [vmem:[#allocation5 + $0x6c0] ss:$48 sps:$4 sm:$0xff]   ;;  %1901 = vmatpush1.bf16.msra.mxu0 %v4803_v7  ;;  %v4811_v13 = vld [vmem:[#allocation5 + $0x124] ss:$48 sps:$4 sm:$0xff]   ;;  %v4856_v44 = vld [vmem:[#allocation5 + $0xc8] ss:$48 sps:$4 sm:$0xff]  }
  0x62   :  { %1944 = vmatpush1.bf16.msra.mxu1 %v4804_v8  ;;  %1902 = vmatprep.subr.bf16.mxu0 %v4805_v9  ;;  %v4813_v14 = vld [vmem:[#allocation5 + $0x724] ss:$48 sps:$4 sm:$0xff]   ;;  %v4815_v15 = vld [vmem:[#allocation5 + $0x120] ss:$48 sps:$4 sm:$0xff]   ;;  %v4864_v47 = vld [vmem:[#allocation5 + $0x12c] ss:$48 sps:$4 sm:$0xff]  }
  0x63   :  { %1945 = vmatprep.subr.bf16.mxu1 %v4807_v10  ;;  %v4816_v16 = vld [vmem:[#allocation5 + $0x720] ss:$48 sps:$4 sm:$0xff]   ;;  %v4817_v17 = vld [vmem:[#allocation5 + $0x184] ss:$48 sps:$4 sm:$0xff]   ;;  %v4862_v48 = vld [vmem:[#allocation5 + $0x128] ss:$48 sps:$4 sm:$0xff]  }
  0x64   :  { %v4819_v18 = vld [vmem:[#allocation5 + $0x784] ss:$48 sps:$4 sm:$0xff]   ;;  %v4821_v19 = vld [vmem:[#allocation5 + $0x180] ss:$48 sps:$4 sm:$0xff]   ;;  %v5640_v51 = vld [vmem:[#allocation2 + $0x4] ss:$12 sps:$4 sm:$0xff]  }
  0x65   :  { %1903 = vmatpush1.bf16.msra.mxu0 %v4809_v11  ;;  %v4822_v20 = vld [vmem:[#allocation5 + $0x780] ss:$48 sps:$4 sm:$0xff]   ;;  %v4823_v21 = vld [vmem:[#allocation5 + $0x1e4] ss:$48 sps:$4 sm:$0xff]   ;;  %v4870_v52 = vld [vmem:[#allocation5 + $0x18c] ss:$48 sps:$4 sm:$0xff]   ;;  %1930 = vmatprep.mubr.bf16.mxu0 %v5640_v51 }
  0x66   :  { %1946 = vmatpush1.bf16.msra.mxu1 %v4810_v12  ;;  %1904 = vmatprep.subr.bf16.mxu0 %v4811_v13  ;;  %v4825_v22 = vld [vmem:[#allocation5 + $0x7e4] ss:$48 sps:$4 sm:$0xff]   ;;  %v4827_v23 = vld [vmem:[#allocation5 + $0x1e0] ss:$48 sps:$4 sm:$0xff]   ;;  %v4868_v53 = vld [vmem:[#allocation5 + $0x188] ss:$48 sps:$4 sm:$0xff]  }
  0x67   :  { %1947 = vmatprep.subr.bf16.mxu1 %v4813_v14  ;;  %v4828_v24 = vld [vmem:[#allocation5 + $0x7e0] ss:$48 sps:$4 sm:$0xff]   ;;  %v4829_v25 = vld [vmem:[#allocation5 + $0x244] ss:$48 sps:$4 sm:$0xff]   ;;  %v4876_v56 = vld [vmem:[#allocation5 + $0x1ec] ss:$48 sps:$4 sm:$0xff]  }
  0x68   :  { %v4831_v26 = vld [vmem:[#allocation5 + $0x844] ss:$48 sps:$4 sm:$0xff]   ;;  %v4833_v27 = vld [vmem:[#allocation5 + $0x240] ss:$48 sps:$4 sm:$0xff]   ;;  %v4874_v57 = vld [vmem:[#allocation5 + $0x1e8] ss:$48 sps:$4 sm:$0xff]  }
  0x69   :  { %1905 = vmatpush1.bf16.msra.mxu0 %v4815_v15  ;;  %v4834_v28 = vld [vmem:[#allocation5 + $0x840] ss:$48 sps:$4 sm:$0xff]   ;;  %v4835_v29 = vld [vmem:[#allocation5 + $0x2a4] ss:$48 sps:$4 sm:$0xff]   ;;  %v4882_v60 = vld [vmem:[#allocation5 + $0x24c] ss:$48 sps:$4 sm:$0xff]  }
  0x6a   :  { %1948 = vmatpush1.bf16.msra.mxu1 %v4816_v16  ;;  %1906 = vmatprep.subr.bf16.mxu0 %v4817_v17  ;;  %v4837_v30 = vld [vmem:[#allocation5 + $0x8a4] ss:$48 sps:$4 sm:$0xff]   ;;  %v4839_v31 = vld [vmem:[#allocation5 + $0x2a0] ss:$48 sps:$4 sm:$0xff]   ;;  %v4880_v61 = vld [vmem:[#allocation5 + $0x248] ss:$48 sps:$4 sm:$0xff]  }
  0x6b   :  { %1949 = vmatprep.subr.bf16.mxu1 %v4819_v18  ;;  %v4840_v32 = vld [vmem:[#allocation5 + $0x8a0] ss:$48 sps:$4 sm:$0xff]   ;;  %v4841_v33 = vld [vmem:[#allocation5 + $0x304] ss:$48 sps:$4 sm:$0xff]   ;;  %v4888_v1 = vld [vmem:[#allocation5 + $0x2ac] ss:$48 sps:$4 sm:$0xff]  }
  0x6c   :  { %v5637_v35 = vld [vmem:[#allocation2 + $0x8] ss:$12 sps:$4 sm:$0xff]   ;;  %v4848_v38 = vld [vmem:[#allocation5 + $0x364] ss:$48 sps:$4 sm:$0xff]   ;;  %v4886_v2 = vld [vmem:[#allocation5 + $0x2a8] ss:$48 sps:$4 sm:$0xff]  }
  0x6d   :  { %1907 = vmatpush1.bf16.msra.mxu0 %v4821_v19  ;;  %v4847_v37 = vld [vmem:[#allocation5 + $0x300] ss:$48 sps:$4 sm:$0xff]   ;;  %v4854_v42 = vld [vmem:[#allocation5 + $0x3c4] ss:$48 sps:$4 sm:$0xff]   ;;  %v4895_v4 = vld [vmem:[#allocation5 + $0x30c] ss:$48 sps:$4 sm:$0xff]  }
  0x6e   :  { %1950 = vmatpush1.bf16.msra.mxu1 %v4822_v20  ;;  %1908 = vmatprep.subr.bf16.mxu0 %v4823_v21  ;;  %v4853_v41 = vld [vmem:[#allocation5 + $0x360] ss:$48 sps:$4 sm:$0xff]   ;;  %v4860_v46 = vld [vmem:[#allocation5 + $0x424] ss:$48 sps:$4 sm:$0xff]   ;;  %v4893_v7 = vld [vmem:[#allocation5 + $0x308] ss:$48 sps:$4 sm:$0xff]  }
  0x6f   :  { %1951 = vmatprep.subr.bf16.mxu1 %v4825_v22  ;;  %v4859_v45 = vld [vmem:[#allocation5 + $0x3c0] ss:$48 sps:$4 sm:$0xff]   ;;  %v4866_v50 = vld [vmem:[#allocation5 + $0x484] ss:$48 sps:$4 sm:$0xff]   ;;  %v4901_v9 = vld [vmem:[#allocation5 + $0x36c] ss:$48 sps:$4 sm:$0xff]  }
  0x70   :  { %v4865_v49 = vld [vmem:[#allocation5 + $0x420] ss:$48 sps:$4 sm:$0xff]   ;;  %v4872_v55 = vld [vmem:[#allocation5 + $0x4e4] ss:$48 sps:$4 sm:$0xff]   ;;  %v4899_v11 = vld [vmem:[#allocation5 + $0x368] ss:$48 sps:$4 sm:$0xff]  }
  0x71   :  { %1909 = vmatpush1.bf16.msra.mxu0 %v4827_v23  ;;  %v4871_v54 = vld [vmem:[#allocation5 + $0x480] ss:$48 sps:$4 sm:$0xff]   ;;  %v4878_v59 = vld [vmem:[#allocation5 + $0x544] ss:$48 sps:$4 sm:$0xff]   ;;  %v4907_v13 = vld [vmem:[#allocation5 + $0x3cc] ss:$48 sps:$4 sm:$0xff]  }
  0x72   :  { %1952 = vmatpush1.bf16.msra.mxu1 %v4828_v24  ;;  %1910 = vmatprep.subr.bf16.mxu0 %v4829_v25  ;;  %v4877_v58 = vld [vmem:[#allocation5 + $0x4e0] ss:$48 sps:$4 sm:$0xff]   ;;  %v4884_v63 = vld [vmem:[#allocation5 + $0x5a4] ss:$48 sps:$4 sm:$0xff]   ;;  %v4905_v15 = vld [vmem:[#allocation5 + $0x3c8] ss:$48 sps:$4 sm:$0xff]  }
  0x73   :  { %1953 = vmatprep.subr.bf16.mxu1 %v4831_v26  ;;  %v4883_v62 = vld [vmem:[#allocation5 + $0x540] ss:$48 sps:$4 sm:$0xff]   ;;  %v4898_v5 = vld [vmem:[#allocation5 + $0x14] ss:$48 sps:$4 sm:$0xff]   ;;  %v4913_v17 = vld [vmem:[#allocation5 + $0x42c] ss:$48 sps:$4 sm:$0xff]  }
  0x74   :  { %v4889_v3 = vld [vmem:[#allocation5 + $0x5a0] ss:$48 sps:$4 sm:$0xff]   ;;  %v5644_v6 = vld [vmem:[#allocation2] ss:$12 sps:$4 sm:$0xff]   ;;  %v4919_v21 = vld [vmem:[#allocation5 + $0x48c] ss:$48 sps:$4 sm:$0xff]  }
  0x75   :  { %1911 = vmatpush1.bf16.msra.mxu0 %v4833_v27  ;;  %v4896_v8 = vld [vmem:[#allocation5 + $0x10] ss:$48 sps:$4 sm:$0xff]   ;;  %v4904_v10 = vld [vmem:[#allocation5 + $0x74] ss:$48 sps:$4 sm:$0xff]   ;;  %v4911_v19 = vld [vmem:[#allocation5 + $0x428] ss:$48 sps:$4 sm:$0xff]  }
  0x76   :  { %1954 = vmatpush1.bf16.msra.mxu1 %v4834_v28  ;;  %1912 = vmatprep.subr.bf16.mxu0 %v4835_v29  ;;  %v4902_v12 = vld [vmem:[#allocation5 + $0x70] ss:$48 sps:$4 sm:$0xff]   ;;  %v4910_v14 = vld [vmem:[#allocation5 + $0xd4] ss:$48 sps:$4 sm:$0xff]   ;;  %v4917_v23 = vld [vmem:[#allocation5 + $0x488] ss:$48 sps:$4 sm:$0xff]  }
  0x77   :  { %1955 = vmatprep.subr.bf16.mxu1 %v4837_v30  ;;  %v4908_v16 = vld [vmem:[#allocation5 + $0xd0] ss:$48 sps:$4 sm:$0xff]   ;;  %v4916_v18 = vld [vmem:[#allocation5 + $0x134] ss:$48 sps:$4 sm:$0xff]   ;;  %v4925_v25 = vld [vmem:[#allocation5 + $0x4ec] ss:$48 sps:$4 sm:$0xff]  }
  0x78   :  { %v4914_v20 = vld [vmem:[#allocation5 + $0x130] ss:$48 sps:$4 sm:$0xff]   ;;  %v4922_v22 = vld [vmem:[#allocation5 + $0x194] ss:$48 sps:$4 sm:$0xff]   ;;  %v4923_v27 = vld [vmem:[#allocation5 + $0x4e8] ss:$48 sps:$4 sm:$0xff]  }
  0x79   :  { %1913 = vmatpush1.bf16.msra.mxu0 %v4839_v31  ;;  %v4920_v24 = vld [vmem:[#allocation5 + $0x190] ss:$48 sps:$4 sm:$0xff]   ;;  %v4928_v26 = vld [vmem:[#allocation5 + $0x1f4] ss:$48 sps:$4 sm:$0xff]   ;;  %v4931_v29 = vld [vmem:[#allocation5 + $0x54c] ss:$48 sps:$4 sm:$0xff]  }
  0x7a   :  { %1956 = vmatpush1.bf16.msra.mxu1 %v4840_v32  ;;  %1914 = vmatprep.subr.bf16.mxu0 %v4841_v33  ;;  %v4926_v28 = vld [vmem:[#allocation5 + $0x1f0] ss:$48 sps:$4 sm:$0xff]   ;;  %v4934_v30 = vld [vmem:[#allocation5 + $0x254] ss:$48 sps:$4 sm:$0xff]   ;;  %v4929_v31 = vld [vmem:[#allocation5 + $0x548] ss:$48 sps:$4 sm:$0xff]  }
  0x7b   :  { %1984 = vmatprep.subr.bf16.mxu1 %v4846_v34  ;;  %v4932_v32 = vld [vmem:[#allocation5 + $0x250] ss:$48 sps:$4 sm:$0xff]   ;;  %v4937_v33 = vld [vmem:[#allocation5 + $0x5ac] ss:$48 sps:$4 sm:$0xff]   ;;  %v4940_v34 = vld [vmem:[#allocation5 + $0x2b4] ss:$48 sps:$4 sm:$0xff]  }
  0x7c   :  { %vm2858_vm1 = vcmask 1043456   ;;  %vm2758_vm2 = vcmask 64512   ;;  %vm3292_vm3 = vcmask 1040384   ;;  %s5545_s4 = smov [#allocation11]  }
  0x7d   :  { %1974 = vmatmul.mubr.bf16.vlgmr.msra.gmra.mrb[0].mxu1 %v5637_v35  ;;  %1915 = vmatpush1.bf16.msra.mxu0 %v4847_v37  ;;  %v4938_v37 = vld [vmem:[#allocation5 + $0x2b0] ss:$48 sps:$4 sm:$0xff]   ;;  %s4147_s28 = sshll.u32 %s5545_s4, 4  ;;  %s4148_s28 = int_to_ptr.vmem [resolvable:$true] %s4147_s28 }
  0x7e   :  { %1985 = vmatpush1.bf16.msra.mxu1 %v4844_v36  ;;  %1916 = vmatprep.subr.bf16.mxu0 %v4848_v38  ;;  %v4935_v36 = vld [vmem:[#allocation5 + $0x5a8] ss:$48 sps:$4 sm:$0xff]   ;;  %v4943_v38 = vld [vmem:[#allocation5 + $0x60c] ss:$48 sps:$4 sm:$0xff]   ;;  %s5502_s29 = scalar_lea.vmem %s4148_s28, 96  ;;  %p5507_p13 = scmp.lt.s32.totalorder %s4148_s28, %s4148_s28 }
  0x7f   :  { %1986 = vmatprep.subr.bf16.mxu1 %v4852_v39  ;;  %2016 = vmatprep.mubr.bf16.mxu1 %v5640_v51  ;;  %v4946_v39 = vld [vmem:[#allocation5 + $0x314] ss:$48 sps:$4 sm:$0xff]   ;;  %p5503_p12 = scmp.ne.s32.totalorder %s4148_s28, %s5502_s29  ;;  %p5508_p0 = scmp.lt.s32.totalorder %s5502_s29, %s5502_s29 }
  0x81   :  { %1917 = vmatpush1.bf16.msra.mxu0 %v4853_v41  ;;  %v4944_v41 = vld [vmem:[#allocation5 + $0x310] ss:$48 sps:$4 sm:$0xff]   ;;  %p5509_p1 = por %p5508_p0, %p5507_p13 }
  0x82   :  { %1987 = vmatpush1.bf16.msra.mxu1 %v4850_v40  ;;  %1918 = vmatprep.subr.bf16.mxu0 %v4854_v42  ;;  %v4941_v40 = vld [vmem:[#allocation5 + $0x608] ss:$48 sps:$4 sm:$0xff]   ;;  %v4949_v42 = vld [vmem:[#allocation5 + $0x66c] ss:$48 sps:$4 sm:$0xff]  }
  0x83   :  { %1988 = vmatprep.subr.bf16.mxu1 %v4858_v43  ;;  %v4952_v43 = vld [vmem:[#allocation5 + $0x374] ss:$48 sps:$4 sm:$0xff]   ;;  %p5510_p2 = pnand %p5509_p1, %p5503_p12 }
  0x85   :  { %1919 = vmatpush1.bf16.msra.mxu0 %v4859_v45  ;;  %v4950_v45 = vld [vmem:[#allocation5 + $0x370] ss:$48 sps:$4 sm:$0xff]  }
  0x86   :  { %1989 = vmatpush1.bf16.msra.mxu1 %v4856_v44  ;;  %1920 = vmatprep.subr.bf16.mxu0 %v4860_v46  ;;  %v4947_v44 = vld [vmem:[#allocation5 + $0x668] ss:$48 sps:$4 sm:$0xff]   ;;  %v4955_v46 = vld [vmem:[#allocation5 + $0x6cc] ss:$48 sps:$4 sm:$0xff]  }
  0x87   :  { %1990 = vmatprep.subr.bf16.mxu1 %v4864_v47  ;;  %v4958_v47 = vld [vmem:[#allocation5 + $0x3d4] ss:$48 sps:$4 sm:$0xff]  }
  0x89   :  { %1921 = vmatpush1.bf16.msra.mxu0 %v4865_v49  ;;  %v4956_v49 = vld [vmem:[#allocation5 + $0x3d0] ss:$48 sps:$4 sm:$0xff]  }
  0x8a   :  { %1991 = vmatpush1.bf16.msra.mxu1 %v4862_v48  ;;  %1922 = vmatprep.subr.bf16.mxu0 %v4866_v50  ;;  %v4953_v48 = vld [vmem:[#allocation5 + $0x6c8] ss:$48 sps:$4 sm:$0xff]   ;;  %v4961_v50 = vld [vmem:[#allocation5 + $0x72c] ss:$48 sps:$4 sm:$0xff]  }
  0x8b   :  { %1992 = vmatprep.subr.bf16.mxu1 %v4870_v52  ;;  %v4964_v52 = vld [vmem:[#allocation5 + $0x434] ss:$48 sps:$4 sm:$0xff]  }
  0x8d   :  { %1923 = vmatpush1.bf16.msra.mxu0 %v4871_v54  ;;  %v4962_v54 = vld [vmem:[#allocation5 + $0x430] ss:$48 sps:$4 sm:$0xff]  }
  0x8e   :  { %1993 = vmatpush1.bf16.msra.mxu1 %v4868_v53  ;;  %1924 = vmatprep.subr.bf16.mxu0 %v4872_v55  ;;  %v4959_v53 = vld [vmem:[#allocation5 + $0x728] ss:$48 sps:$4 sm:$0xff]   ;;  %v4967_v55 = vld [vmem:[#allocation5 + $0x78c] ss:$48 sps:$4 sm:$0xff]  }
  0x8f   :  { %1994 = vmatprep.subr.bf16.mxu1 %v4876_v56  ;;  %v4970_v56 = vld [vmem:[#allocation5 + $0x494] ss:$48 sps:$4 sm:$0xff]  }
  0x91   :  { %1925 = vmatpush1.bf16.msra.mxu0 %v4877_v58  ;;  %v4968_v58 = vld [vmem:[#allocation5 + $0x490] ss:$48 sps:$4 sm:$0xff]  }
  0x92   :  { %1995 = vmatpush1.bf16.msra.mxu1 %v4874_v57  ;;  %1926 = vmatprep.subr.bf16.mxu0 %v4878_v59  ;;  %v4965_v57 = vld [vmem:[#allocation5 + $0x788] ss:$48 sps:$4 sm:$0xff]   ;;  %v4973_v59 = vld [vmem:[#allocation5 + $0x7ec] ss:$48 sps:$4 sm:$0xff]  }
  0x93   :  { %1996 = vmatprep.subr.bf16.mxu1 %v4882_v60  ;;  %v4976_v60 = vld [vmem:[#allocation5 + $0x4f4] ss:$48 sps:$4 sm:$0xff]  }
  0x95   :  { %1927 = vmatpush1.bf16.msra.mxu0 %v4883_v62  ;;  %v4974_v62 = vld [vmem:[#allocation5 + $0x4f0] ss:$48 sps:$4 sm:$0xff]  }
  0x96   :  { %1997 = vmatpush1.bf16.msra.mxu1 %v4880_v61  ;;  %1928 = vmatprep.subr.bf16.mxu0 %v4884_v63  ;;  %v4971_v61 = vld [vmem:[#allocation5 + $0x7e8] ss:$48 sps:$4 sm:$0xff]   ;;  %v4979_v63 = vld [vmem:[#allocation5 + $0x84c] ss:$48 sps:$4 sm:$0xff]  }
  0x97   :  { %1998 = vmatprep.subr.bf16.mxu1 %v4888_v1  ;;  %v4982_v1 = vld [vmem:[#allocation5 + $0x554] ss:$48 sps:$4 sm:$0xff]  }
  0x99   :  { %1929 = vmatpush1.bf16.msra.mxu0 %v4889_v3  ;;  %v4980_v3 = vld [vmem:[#allocation5 + $0x550] ss:$48 sps:$4 sm:$0xff]  }
  0x9a   :  { %1999 = vmatpush1.bf16.msra.mxu1 %v4886_v2  ;;  %2070 = vmatprep.subr.bf16.mxu0 %v4898_v5  ;;  %v4977_v2 = vld [vmem:[#allocation5 + $0x848] ss:$48 sps:$4 sm:$0xff]   ;;  %v4988_v5 = vld [vmem:[#allocation5 + $0x5b4] ss:$48 sps:$4 sm:$0xff]  }
  0x9b   :  { %2000 = vmatprep.subr.bf16.mxu1 %v4895_v4  ;;  %v4985_v4 = vld [vmem:[#allocation5 + $0x8ac] ss:$48 sps:$4 sm:$0xff]  }
  0x9c   :  { %1931 = vmatmul.mubr.bf16.vlgmr.msra.gmra.mrb[0].mxu0 %v5644_v6 }
  0x9d   :  { %2071 = vmatpush1.bf16.msra.mxu0 %v4896_v8  ;;  %2102 = vmatprep.mubr.bf16.mxu0 %v5640_v51  ;;  %v4986_v8 = vld [vmem:[#allocation5 + $0x5b0] ss:$48 sps:$4 sm:$0xff]  }
  0x9e   :  { %2001 = vmatpush1.bf16.msra.mxu1 %v4893_v7  ;;  %2072 = vmatprep.subr.bf16.mxu0 %v4904_v10  ;;  %v4983_v7 = vld [vmem:[#allocation5 + $0x8a8] ss:$48 sps:$4 sm:$0xff]   ;;  %v4994_v10 = vld [vmem:[#allocation5 + $0x1c] ss:$48 sps:$4 sm:$0xff]  }
  0x9f   :  { %2002 = vmatprep.subr.bf16.mxu1 %v4901_v9  ;;  %v4991_v9 = vld [vmem:[#allocation5 + $0x614] ss:$48 sps:$4 sm:$0xff]  }
  0xa1   :  { %2073 = vmatpush1.bf16.msra.mxu0 %v4902_v12  ;;  %v4992_v12 = vld [vmem:[#allocation5 + $0x18] ss:$48 sps:$4 sm:$0xff]  }
  0xa2   :  { %2003 = vmatpush1.bf16.msra.mxu1 %v4899_v11  ;;  %2074 = vmatprep.subr.bf16.mxu0 %v4910_v14  ;;  %v4989_v11 = vld [vmem:[#allocation5 + $0x610] ss:$48 sps:$4 sm:$0xff]   ;;  %v5000_v14 = vld [vmem:[#allocation5 + $0x7c] ss:$48 sps:$4 sm:$0xff]  }
  0xa3   :  { %2004 = vmatprep.subr.bf16.mxu1 %v4907_v13  ;;  %v4997_v13 = vld [vmem:[#allocation5 + $0x674] ss:$48 sps:$4 sm:$0xff]  }
  0xa5   :  { %2075 = vmatpush1.bf16.msra.mxu0 %v4908_v16  ;;  %v4998_v16 = vld [vmem:[#allocation5 + $0x78] ss:$48 sps:$4 sm:$0xff]  }
  0xa6   :  { %2005 = vmatpush1.bf16.msra.mxu1 %v4905_v15  ;;  %2076 = vmatprep.subr.bf16.mxu0 %v4916_v18  ;;  %v4995_v15 = vld [vmem:[#allocation5 + $0x670] ss:$48 sps:$4 sm:$0xff]   ;;  %v5006_v18 = vld [vmem:[#allocation5 + $0xdc] ss:$48 sps:$4 sm:$0xff]  }
  0xa7   :  { %2006 = vmatprep.subr.bf16.mxu1 %v4913_v17  ;;  %v5003_v17 = vld [vmem:[#allocation5 + $0x6d4] ss:$48 sps:$4 sm:$0xff]  }
  0xa9   :  { %2077 = vmatpush1.bf16.msra.mxu0 %v4914_v20  ;;  %v5004_v20 = vld [vmem:[#allocation5 + $0xd8] ss:$48 sps:$4 sm:$0xff]  }
  0xaa   :  { %2007 = vmatpush1.bf16.msra.mxu1 %v4911_v19  ;;  %2078 = vmatprep.subr.bf16.mxu0 %v4922_v22  ;;  %v5001_v19 = vld [vmem:[#allocation5 + $0x6d0] ss:$48 sps:$4 sm:$0xff]   ;;  %v5012_v22 = vld [vmem:[#allocation5 + $0x13c] ss:$48 sps:$4 sm:$0xff]  }
  0xab   :  { %2008 = vmatprep.subr.bf16.mxu1 %v4919_v21  ;;  %v5009_v21 = vld [vmem:[#allocation5 + $0x734] ss:$48 sps:$4 sm:$0xff]  }
  0xad   :  { %2079 = vmatpush1.bf16.msra.mxu0 %v4920_v24  ;;  %v5010_v24 = vld [vmem:[#allocation5 + $0x138] ss:$48 sps:$4 sm:$0xff]  }
  0xae   :  { %2009 = vmatpush1.bf16.msra.mxu1 %v4917_v23  ;;  %2080 = vmatprep.subr.bf16.mxu0 %v4928_v26  ;;  %v5007_v23 = vld [vmem:[#allocation5 + $0x730] ss:$48 sps:$4 sm:$0xff]   ;;  %v5018_v26 = vld [vmem:[#allocation5 + $0x19c] ss:$48 sps:$4 sm:$0xff]  }
  0xaf   :  { %2010 = vmatprep.subr.bf16.mxu1 %v4925_v25  ;;  %v5015_v25 = vld [vmem:[#allocation5 + $0x794] ss:$48 sps:$4 sm:$0xff]  }
  0xb1   :  { %2081 = vmatpush1.bf16.msra.mxu0 %v4926_v28  ;;  %v5016_v28 = vld [vmem:[#allocation5 + $0x198] ss:$48 sps:$4 sm:$0xff]  }
  0xb2   :  { %2011 = vmatpush1.bf16.msra.mxu1 %v4923_v27  ;;  %2082 = vmatprep.subr.bf16.mxu0 %v4934_v30  ;;  %v5013_v27 = vld [vmem:[#allocation5 + $0x790] ss:$48 sps:$4 sm:$0xff]   ;;  %v5024_v30 = vld [vmem:[#allocation5 + $0x1fc] ss:$48 sps:$4 sm:$0xff]  }
  0xb3   :  { %2012 = vmatprep.subr.bf16.mxu1 %v4931_v29  ;;  %v5021_v29 = vld [vmem:[#allocation5 + $0x7f4] ss:$48 sps:$4 sm:$0xff]  }
  0xb5   :  { %2083 = vmatpush1.bf16.msra.mxu0 %v4932_v32  ;;  %v5022_v32 = vld [vmem:[#allocation5 + $0x1f8] ss:$48 sps:$4 sm:$0xff]  }
  0xb6   :  { %2013 = vmatpush1.bf16.msra.mxu1 %v4929_v31  ;;  %2084 = vmatprep.subr.bf16.mxu0 %v4940_v34  ;;  %v5019_v31 = vld [vmem:[#allocation5 + $0x7f0] ss:$48 sps:$4 sm:$0xff]   ;;  %v5030_v34 = vld [vmem:[#allocation5 + $0x25c] ss:$48 sps:$4 sm:$0xff]  }
  0xb7   :  { %2014 = vmatprep.subr.bf16.mxu1 %v4937_v33  ;;  %v5027_v33 = vld [vmem:[#allocation5 + $0x854] ss:$48 sps:$4 sm:$0xff]  }
  0xb9   :  { %2085 = vmatpush1.bf16.msra.mxu0 %v4938_v37  ;;  %v5028_v37 = vld [vmem:[#allocation5 + $0x258] ss:$48 sps:$4 sm:$0xff]  }
  0xba   :  { %2015 = vmatpush1.bf16.msra.mxu1 %v4935_v36  ;;  %2086 = vmatprep.subr.bf16.mxu0 %v4946_v39  ;;  %v5025_v36 = vld [vmem:[#allocation5 + $0x850] ss:$48 sps:$4 sm:$0xff]   ;;  %v5036_v39 = vld [vmem:[#allocation5 + $0x2bc] ss:$48 sps:$4 sm:$0xff]  }
  0xbb   :  { %2027 = vmatprep.subr.bf16.mxu1 %v4943_v38  ;;  %v5033_v38 = vld [vmem:[#allocation5 + $0x8b4] ss:$48 sps:$4 sm:$0xff]  }
  0xbd   :  { %2017 = vmatmul.mubr.bf16.vlgmr.msra.gmra.mrb[4].mxu1 %v5644_v6  ;;  %2087 = vmatpush1.bf16.msra.mxu0 %v4944_v41  ;;  %v5034_v41 = vld [vmem:[#allocation5 + $0x2b8] ss:$48 sps:$4 sm:$0xff]  }
  0xbe   :  { %2028 = vmatpush1.bf16.msra.mxu1 %v4941_v40  ;;  %2088 = vmatprep.subr.bf16.mxu0 %v4952_v43  ;;  %v5031_v40 = vld [vmem:[#allocation5 + $0x8b0] ss:$48 sps:$4 sm:$0xff]   ;;  %v5087_v43 = vld [vmem:[#allocation5 + $0x24] ss:$48 sps:$4 sm:$0xff]  }
  0xbf   :  { %2029 = vmatprep.subr.bf16.mxu1 %v4949_v42  ;;  %2059 = vmatprep.mubr.bf16.mxu1 %v5541_v0  ;;  %v5039_v42 = vld [vmem:[#allocation5 + $0x31c] ss:$48 sps:$4 sm:$0xff]  }
  0xc1   :  { %2089 = vmatpush1.bf16.msra.mxu0 %v4950_v45  ;;  %v5085_v45 = vld [vmem:[#allocation5 + $0x20] ss:$48 sps:$4 sm:$0xff]  }
  0xc2   :  { %2030 = vmatpush1.bf16.msra.mxu1 %v4947_v44  ;;  %2090 = vmatprep.subr.bf16.mxu0 %v4958_v47  ;;  %v5037_v44 = vld [vmem:[#allocation5 + $0x318] ss:$48 sps:$4 sm:$0xff]   ;;  %v5093_v47 = vld [vmem:[#allocation5 + $0x84] ss:$48 sps:$4 sm:$0xff]  }
  0xc3   :  { %2031 = vmatprep.subr.bf16.mxu1 %v4955_v46  ;;  %v5042_v46 = vld [vmem:[#allocation5 + $0x37c] ss:$48 sps:$4 sm:$0xff]  }
  0xc5   :  { %2091 = vmatpush1.bf16.msra.mxu0 %v4956_v49  ;;  %v5091_v49 = vld [vmem:[#allocation5 + $0x80] ss:$48 sps:$4 sm:$0xff]  }
  0xc6   :  { %2032 = vmatpush1.bf16.msra.mxu1 %v4953_v48  ;;  %2092 = vmatprep.subr.bf16.mxu0 %v4964_v52  ;;  %v5040_v48 = vld [vmem:[#allocation5 + $0x378] ss:$48 sps:$4 sm:$0xff]   ;;  %v5099_v52 = vld [vmem:[#allocation5 + $0xe4] ss:$48 sps:$4 sm:$0xff]  }
  0xc7   :  { %2033 = vmatprep.subr.bf16.mxu1 %v4961_v50  ;;  %v5045_v50 = vld [vmem:[#allocation5 + $0x3dc] ss:$48 sps:$4 sm:$0xff]  }
  0xc9   :  { %2093 = vmatpush1.bf16.msra.mxu0 %v4962_v54  ;;  %v5097_v54 = vld [vmem:[#allocation5 + $0xe0] ss:$48 sps:$4 sm:$0xff]  }
  0xca   :  { %2034 = vmatpush1.bf16.msra.mxu1 %v4959_v53  ;;  %2094 = vmatprep.subr.bf16.mxu0 %v4970_v56  ;;  %v5043_v53 = vld [vmem:[#allocation5 + $0x3d8] ss:$48 sps:$4 sm:$0xff]   ;;  %v5105_v56 = vld [vmem:[#allocation5 + $0x144] ss:$48 sps:$4 sm:$0xff]  }
  0xcb   :  { %2035 = vmatprep.subr.bf16.mxu1 %v4967_v55  ;;  %v5048_v55 = vld [vmem:[#allocation5 + $0x43c] ss:$48 sps:$4 sm:$0xff]  }
  0xcd   :  { %2095 = vmatpush1.bf16.msra.mxu0 %v4968_v58  ;;  %v5051_v58 = vld [vmem:[#allocation5 + $0x49c] ss:$48 sps:$4 sm:$0xff]  }
  0xce   :  { %2036 = vmatpush1.bf16.msra.mxu1 %v4965_v57  ;;  %2096 = vmatprep.subr.bf16.mxu0 %v4976_v60  ;;  %v5103_v57 = vld [vmem:[#allocation5 + $0x140] ss:$48 sps:$4 sm:$0xff]   ;;  %v5049_v60 = vld [vmem:[#allocation5 + $0x498] ss:$48 sps:$4 sm:$0xff]  }
  0xcf   :  { %2037 = vmatprep.subr.bf16.mxu1 %v4973_v59  ;;  %v5111_v59 = vld [vmem:[#allocation5 + $0x1a4] ss:$48 sps:$4 sm:$0xff]  }
  0xd1   :  { %2097 = vmatpush1.bf16.msra.mxu0 %v4974_v62  ;;  %v5109_v62 = vld [vmem:[#allocation5 + $0x1a0] ss:$48 sps:$4 sm:$0xff]  }
  0xd2   :  { %2038 = vmatpush1.bf16.msra.mxu1 %v4971_v61  ;;  %2098 = vmatprep.subr.bf16.mxu0 %v4982_v1  ;;  %v5054_v61 = vld [vmem:[#allocation5 + $0x4fc] ss:$48 sps:$4 sm:$0xff]   ;;  %v5115_v1 = vld [vmem:[#allocation5 + $0x200] ss:$48 sps:$4 sm:$0xff]  }
  0xd3   :  { %2039 = vmatprep.subr.bf16.mxu1 %v4979_v63  ;;  %v5052_v63 = vld [vmem:[#allocation5 + $0x4f8] ss:$48 sps:$4 sm:$0xff]  }
  0xd5   :  { %2099 = vmatpush1.bf16.msra.mxu0 %v4980_v3  ;;  %v5123_v3 = vld [vmem:[#allocation5 + $0x264] ss:$48 sps:$4 sm:$0xff]  }
  0xd6   :  { %2040 = vmatpush1.bf16.msra.mxu1 %v4977_v2  ;;  %2100 = vmatprep.subr.bf16.mxu0 %v4988_v5  ;;  %v5057_v2 = vld [vmem:[#allocation5 + $0x55c] ss:$48 sps:$4 sm:$0xff]   ;;  %v5121_v5 = vld [vmem:[#allocation5 + $0x260] ss:$48 sps:$4 sm:$0xff]  }
  0xd7   :  { %2041 = vmatprep.subr.bf16.mxu1 %v4985_v4  ;;  %v5055_v4 = vld [vmem:[#allocation5 + $0x558] ss:$48 sps:$4 sm:$0xff]  }
  0xd9   :  { %2101 = vmatpush1.bf16.msra.mxu0 %v4986_v8  ;;  %v5129_v8 = vld [vmem:[#allocation5 + $0x2c4] ss:$48 sps:$4 sm:$0xff]  }
  0xda   :  { %2042 = vmatpush1.bf16.msra.mxu1 %v4983_v7  ;;  %2113 = vmatprep.subr.bf16.mxu0 %v4991_v9  ;;  %v5060_v7 = vld [vmem:[#allocation5 + $0x5bc] ss:$48 sps:$4 sm:$0xff]   ;;  %v5058_v9 = vld [vmem:[#allocation5 + $0x5b8] ss:$48 sps:$4 sm:$0xff]  }
  0xdb   :  { %2156 = vmatprep.subr.bf16.mxu1 %v4994_v10  ;;  %v5127_v10 = vld [vmem:[#allocation5 + $0x2c0] ss:$48 sps:$4 sm:$0xff]  }
  0xdc   :  { %2103 = vmatmul.mubr.bf16.vlgmr.msra.gmra.mrb[4].mxu0 %v5644_v6 }
  0xdd   :  { %2060 = vmatmul.mubr.bf16.vlgmr.msra.gmra.mrb[4].mxu1 %v5637_v35  ;;  %2114 = vmatpush1.bf16.msra.mxu0 %v4989_v11  ;;  %v5063_v11 = vld [vmem:[#allocation5 + $0x61c] ss:$48 sps:$4 sm:$0xff]  }
  0xde   :  { %2157 = vmatpush1.bf16.msra.mxu1 %v4992_v12  ;;  %2115 = vmatprep.subr.bf16.mxu0 %v4997_v13  ;;  %v5135_v12 = vld [vmem:[#allocation5 + $0x324] ss:$48 sps:$4 sm:$0xff]   ;;  %v5061_v13 = vld [vmem:[#allocation5 + $0x618] ss:$48 sps:$4 sm:$0xff]  }
  0xdf   :  { %2158 = vmatprep.subr.bf16.mxu1 %v5000_v14  ;;  %2145 = vmatprep.mubr.bf16.mxu0 %v5541_v0  ;;  %v5066_v14 = vld [vmem:[#allocation5 + $0x67c] ss:$48 sps:$4 sm:$0xff]  }
  0xe0   :  { %2188 = vmatprep.mubr.bf16.mxu1 %v5640_v51 }
  0xe1   :  { %2116 = vmatpush1.bf16.msra.mxu0 %v4995_v15  ;;  %v5133_v15 = vld [vmem:[#allocation5 + $0x320] ss:$48 sps:$4 sm:$0xff]  }
  0xe2   :  { %2159 = vmatpush1.bf16.msra.mxu1 %v4998_v16  ;;  %2117 = vmatprep.subr.bf16.mxu0 %v5003_v17  ;;  %v5141_v16 = vld [vmem:[#allocation5 + $0x384] ss:$48 sps:$4 sm:$0xff]   ;;  %v5064_v17 = vld [vmem:[#allocation5 + $0x678] ss:$48 sps:$4 sm:$0xff]  }
  0xe3   :  { %2160 = vmatprep.subr.bf16.mxu1 %v5006_v18  ;;  %v5069_v18 = vld [vmem:[#allocation5 + $0x6dc] ss:$48 sps:$4 sm:$0xff]  }
  0xe5   :  { %2118 = vmatpush1.bf16.msra.mxu0 %v5001_v19  ;;  %v5139_v19 = vld [vmem:[#allocation5 + $0x380] ss:$48 sps:$4 sm:$0xff]  }
  0xe6   :  { %2161 = vmatpush1.bf16.msra.mxu1 %v5004_v20  ;;  %2119 = vmatprep.subr.bf16.mxu0 %v5009_v21  ;;  %v5147_v20 = vld [vmem:[#allocation5 + $0x3e4] ss:$48 sps:$4 sm:$0xff]   ;;  %v5067_v21 = vld [vmem:[#allocation5 + $0x6d8] ss:$48 sps:$4 sm:$0xff]  }
  0xe7   :  { %2162 = vmatprep.subr.bf16.mxu1 %v5012_v22  ;;  %v5072_v22 = vld [vmem:[#allocation5 + $0x73c] ss:$48 sps:$4 sm:$0xff]  }
  0xe9   :  { %2120 = vmatpush1.bf16.msra.mxu0 %v5007_v23  ;;  %v5145_v23 = vld [vmem:[#allocation5 + $0x3e0] ss:$48 sps:$4 sm:$0xff]  }
  0xea   :  { %2163 = vmatpush1.bf16.msra.mxu1 %v5010_v24  ;;  %2121 = vmatprep.subr.bf16.mxu0 %v5015_v25  ;;  %v5153_v24 = vld [vmem:[#allocation5 + $0x444] ss:$48 sps:$4 sm:$0xff]   ;;  %v5070_v25 = vld [vmem:[#allocation5 + $0x738] ss:$48 sps:$4 sm:$0xff]  }
  0xeb   :  { %2164 = vmatprep.subr.bf16.mxu1 %v5018_v26  ;;  %v5075_v26 = vld [vmem:[#allocation5 + $0x79c] ss:$48 sps:$4 sm:$0xff]  }
  0xed   :  { %2122 = vmatpush1.bf16.msra.mxu0 %v5013_v27  ;;  %v5159_v27 = vld [vmem:[#allocation5 + $0x4a4] ss:$48 sps:$4 sm:$0xff]  }
  0xee   :  { %2165 = vmatpush1.bf16.msra.mxu1 %v5016_v28  ;;  %2123 = vmatprep.subr.bf16.mxu0 %v5021_v29  ;;  %v5073_v28 = vld [vmem:[#allocation5 + $0x798] ss:$48 sps:$4 sm:$0xff]   ;;  %v5078_v29 = vld [vmem:[#allocation5 + $0x7fc] ss:$48 sps:$4 sm:$0xff]  }
  0xef   :  { %2166 = vmatprep.subr.bf16.mxu1 %v5024_v30  ;;  %v5157_v30 = vld [vmem:[#allocation5 + $0x4a0] ss:$48 sps:$4 sm:$0xff]  }
  0xf1   :  { %2124 = vmatpush1.bf16.msra.mxu0 %v5019_v31  ;;  %v5165_v31 = vld [vmem:[#allocation5 + $0x504] ss:$48 sps:$4 sm:$0xff]  }
  0xf2   :  { %2167 = vmatpush1.bf16.msra.mxu1 %v5022_v32  ;;  %2125 = vmatprep.subr.bf16.mxu0 %v5027_v33  ;;  %v5076_v32 = vld [vmem:[#allocation5 + $0x7f8] ss:$48 sps:$4 sm:$0xff]   ;;  %v5081_v33 = vld [vmem:[#allocation5 + $0x85c] ss:$48 sps:$4 sm:$0xff]  }
  0xf3   :  { %2168 = vmatprep.subr.bf16.mxu1 %v5030_v34  ;;  %v5163_v34 = vld [vmem:[#allocation5 + $0x500] ss:$48 sps:$4 sm:$0xff]  }
  0xf5   :  { %2126 = vmatpush1.bf16.msra.mxu0 %v5025_v36  ;;  %v5171_v36 = vld [vmem:[#allocation5 + $0x564] ss:$48 sps:$4 sm:$0xff]  }
  0xf6   :  { %2169 = vmatpush1.bf16.msra.mxu1 %v5028_v37  ;;  %2127 = vmatprep.subr.bf16.mxu0 %v5033_v38  ;;  %v5079_v37 = vld [vmem:[#allocation5 + $0x858] ss:$48 sps:$4 sm:$0xff]   ;;  %v5084_v38 = vld [vmem:[#allocation5 + $0x8bc] ss:$48 sps:$4 sm:$0xff]  }
  0xf7   :  { %2170 = vmatprep.subr.bf16.mxu1 %v5036_v39  ;;  %v5169_v39 = vld [vmem:[#allocation5 + $0x560] ss:$48 sps:$4 sm:$0xff]  }
  0xf9   :  { %2128 = vmatpush1.bf16.msra.mxu0 %v5031_v40  ;;  %v5177_v40 = vld [vmem:[#allocation5 + $0x5c4] ss:$48 sps:$4 sm:$0xff]  }
  0xfa   :  { %2171 = vmatpush1.bf16.msra.mxu1 %v5034_v41  ;;  %2242 = vmatprep.subr.bf16.mxu0 %v5087_v43  ;;  %v5082_v41 = vld [vmem:[#allocation5 + $0x8b8] ss:$48 sps:$4 sm:$0xff]   ;;  %v5175_v43 = vld [vmem:[#allocation5 + $0x5c0] ss:$48 sps:$4 sm:$0xff]  }
  0xfb   :  { %2172 = vmatprep.subr.bf16.mxu1 %v5039_v42  ;;  %v5090_v42 = vld [vmem:[#allocation5 + $0x2c] ss:$48 sps:$4 sm:$0xff]  }
  0xfc   :  { %2146 = vmatmul.mubr.bf16.vlgmr.msra.gmra.mrb[4].mxu0 %v5637_v35  ;;  %v5046_v35 = vld [vmem:[#allocation5 + $0x438] ss:$48 sps:$4 sm:$0xff]  }
  0xfd   :  { %2243 = vmatpush1.bf16.msra.mxu0 %v5085_v45  ;;  %2274 = vmatprep.mubr.bf16.mxu0 %v5640_v51  ;;  %v5117_v51 = vld [vmem:[#allocation5 + $0x204] ss:$48 sps:$4 sm:$0xff]   ;;  %v5088_v45 = vld [vmem:[#allocation5 + $0x28] ss:$48 sps:$4 sm:$0xff]  }
  0xfe   :  { %2173 = vmatpush1.bf16.msra.mxu1 %v5037_v44  ;;  %2244 = vmatprep.subr.bf16.mxu0 %v5093_v47  ;;  %v5183_v44 = vld [vmem:[#allocation5 + $0x624] ss:$48 sps:$4 sm:$0xff]   ;;  %v5181_v47 = vld [vmem:[#allocation5 + $0x620] ss:$48 sps:$4 sm:$0xff]  }
  0xff   :  { %2174 = vmatprep.subr.bf16.mxu1 %v5042_v46  ;;  %v5096_v46 = vld [vmem:[#allocation5 + $0x8c] ss:$48 sps:$4 sm:$0xff]  }
 0x101   :  { %2245 = vmatpush1.bf16.msra.mxu0 %v5091_v49  ;;  %v5189_v49 = vld [vmem:[#allocation5 + $0x684] ss:$48 sps:$4 sm:$0xff]  }
 0x102   :  { %2175 = vmatpush1.bf16.msra.mxu1 %v5040_v48  ;;  %2246 = vmatprep.subr.bf16.mxu0 %v5099_v52  ;;  %v5094_v48 = vld [vmem:[#allocation5 + $0x88] ss:$48 sps:$4 sm:$0xff]   ;;  %v5102_v52 = vld [vmem:[#allocation5 + $0xec] ss:$48 sps:$4 sm:$0xff]  }
 0x103   :  { %2176 = vmatprep.subr.bf16.mxu1 %v5045_v50  ;;  %v5658_v50 = vld [vmem:[#allocation2 + $0x8] ss:$12 sps:$4 sm:$0xff]  }
 0x105   :  { %2247 = vmatpush1.bf16.msra.mxu0 %v5097_v54  ;;  %v5661_v54 = vld [vmem:[#allocation2] ss:$12 sps:$4 sm:$0xff]  }
 0x106   :  { %2177 = vmatpush1.bf16.msra.mxu1 %v5043_v53  ;;  %2248 = vmatprep.subr.bf16.mxu0 %v5105_v56  ;;  %v5187_v53 = vld [vmem:[#allocation5 + $0x680] ss:$48 sps:$4 sm:$0xff]   ;;  %v5100_v56 = vld [vmem:[#allocation5 + $0xe8] ss:$48 sps:$4 sm:$0xff]  }
 0x107   :  { %2178 = vmatprep.subr.bf16.mxu1 %v5048_v55  ;;  %v5195_v55 = vld [vmem:[#allocation5 + $0x6e4] ss:$48 sps:$4 sm:$0xff]  }
 0x109   :  { %2249 = vmatpush1.bf16.msra.mxu0 %v5103_v57  ;;  %v5108_v57 = vld [vmem:[#allocation5 + $0x14c] ss:$48 sps:$4 sm:$0xff]  }
 0x10a   :  { %2179 = vmatpush1.bf16.msra.mxu1 %v5046_v35  ;;  %2250 = vmatprep.subr.bf16.mxu0 %v5111_v59  ;;  %v5391_v35 = vld [vmem:[#allocation2 + $0x4] ss:$12 sps:$4 sm:$0xff]   ;;  %v5201_v59 = vld [vmem:[#allocation5 + $0x744] ss:$48 sps:$4 sm:$0xff]  }
 0x10b   :  { %2180 = vmatprep.subr.bf16.mxu1 %v5051_v58  ;;  %v5193_v58 = vld [vmem:[#allocation5 + $0x6e0] ss:$48 sps:$4 sm:$0xff]  }
 0x10d   :  { %2251 = vmatpush1.bf16.msra.mxu0 %v5109_v62  ;;  %v5199_v62 = vld [vmem:[#allocation5 + $0x740] ss:$48 sps:$4 sm:$0xff]  }
 0x10e   :  { %2181 = vmatpush1.bf16.msra.mxu1 %v5049_v60  ;;  %2252 = vmatprep.subr.bf16.mxu0 %v5117_v51  ;;  %v5106_v60 = vld [vmem:[#allocation5 + $0x148] ss:$48 sps:$4 sm:$0xff]   ;;  %v5207_v51 = vld [vmem:[#allocation5 + $0x7a4] ss:$48 sps:$4 sm:$0xff]  }
 0x10f   :  { %2182 = vmatprep.subr.bf16.mxu1 %v5054_v61  ;;  %v5114_v61 = vld [vmem:[#allocation5 + $0x1ac] ss:$48 sps:$4 sm:$0xff]  }
 0x111   :  { %2253 = vmatpush1.bf16.msra.mxu0 %v5115_v1  ;;  %v5120_v1 = vld [vmem:[#allocation5 + $0x20c] ss:$48 sps:$4 sm:$0xff]  }
 0x112   :  { %2183 = vmatpush1.bf16.msra.mxu1 %v5052_v63  ;;  %2254 = vmatprep.subr.bf16.mxu0 %v5123_v3  ;;  %v5112_v63 = vld [vmem:[#allocation5 + $0x1a8] ss:$48 sps:$4 sm:$0xff]   ;;  %v5213_v3 = vld [vmem:[#allocation5 + $0x804] ss:$48 sps:$4 sm:$0xff]  }
 0x113   :  { %2184 = vmatprep.subr.bf16.mxu1 %v5057_v2  ;;  %v5205_v2 = vld [vmem:[#allocation5 + $0x7a0] ss:$48 sps:$4 sm:$0xff]  }
 0x115   :  { %2255 = vmatpush1.bf16.msra.mxu0 %v5121_v5  ;;  %v5126_v5 = vld [vmem:[#allocation5 + $0x26c] ss:$48 sps:$4 sm:$0xff]  }
 0x116   :  { %2185 = vmatpush1.bf16.msra.mxu1 %v5055_v4  ;;  %2256 = vmatprep.subr.bf16.mxu0 %v5129_v8  ;;  %v5118_v4 = vld [vmem:[#allocation5 + $0x208] ss:$48 sps:$4 sm:$0xff]  }
 0x117   :  { %2186 = vmatprep.subr.bf16.mxu1 %v5060_v7  ;;  %v5211_v7 = vld [vmem:[#allocation5 + $0x800] ss:$48 sps:$4 sm:$0xff]  }
 0x119   :  { %2257 = vmatpush1.bf16.msra.mxu0 %v5127_v10 }
 0x11a   :  { %2187 = vmatpush1.bf16.msra.mxu1 %v5058_v9  ;;  %2258 = vmatprep.subr.bf16.mxu0 %v5135_v12  ;;  %v5219_v9 = vld [vmem:[#allocation5 + $0x864] ss:$48 sps:$4 sm:$0xff]   ;;  %v5124_v12 = vld [vmem:[#allocation5 + $0x268] ss:$48 sps:$4 sm:$0xff]  }
 0x11b   :  { %2199 = vmatprep.subr.bf16.mxu1 %v5063_v11 }
 0x11d   :  { %2189 = vmatmul.mubr.bf16.vlgmr.msra.gmra.mrb[8].mxu1 %v5644_v6  ;;  %2259 = vmatpush1.bf16.msra.mxu0 %v5133_v15  ;;  %v5151_v6 = vld [vmem:[#allocation5 + $0x440] ss:$48 sps:$4 sm:$0xff]  }
 0x11e   :  { %2200 = vmatpush1.bf16.msra.mxu1 %v5061_v13  ;;  %2231 = vmatprep.mubr.bf16.mxu1 %v5541_v0  ;;  %v5217_v15 = vld [vmem:[#allocation5 + $0x860] ss:$48 sps:$4 sm:$0xff]  }
 0x11f   :  { %2201 = vmatprep.subr.bf16.mxu1 %v5066_v14  ;;  %2260 = vmatprep.subr.bf16.mxu0 %v5141_v16  ;;  %v5132_v14 = vld [vmem:[#allocation5 + $0x2cc] ss:$48 sps:$4 sm:$0xff]   ;;  %v5225_v16 = vld [vmem:[#allocation5 + $0x8c4] ss:$48 sps:$4 sm:$0xff]  }
 0x121   :  { %2261 = vmatpush1.bf16.msra.mxu0 %v5139_v19  ;;  %v5223_v19 = vld [vmem:[#allocation5 + $0x8c0] ss:$48 sps:$4 sm:$0xff]  }
 0x122   :  { %2202 = vmatpush1.bf16.msra.mxu1 %v5064_v17  ;;  %2262 = vmatprep.subr.bf16.mxu0 %v5147_v20  ;;  %v5130_v17 = vld [vmem:[#allocation5 + $0x2c8] ss:$48 sps:$4 sm:$0xff]  }
 0x123   :  { %2203 = vmatprep.subr.bf16.mxu1 %v5069_v18  ;;  %v5138_v18 = vld [vmem:[#allocation5 + $0x32c] ss:$48 sps:$4 sm:$0xff]   ;;  %v5136_v20 = vld [vmem:[#allocation5 + $0x328] ss:$48 sps:$4 sm:$0xff]  }
 0x125   :  { %2263 = vmatpush1.bf16.msra.mxu0 %v5145_v23  ;;  %v5142_v23 = vld [vmem:[#allocation5 + $0x388] ss:$48 sps:$4 sm:$0xff]  }
 0x126   :  { %2204 = vmatpush1.bf16.msra.mxu1 %v5067_v21  ;;  %2264 = vmatprep.subr.bf16.mxu0 %v5153_v24  ;;  %v5144_v21 = vld [vmem:[#allocation5 + $0x38c] ss:$48 sps:$4 sm:$0xff]  }
 0x127   :  { %2205 = vmatprep.subr.bf16.mxu1 %v5072_v22  ;;  %v5542_v22 = vmov 0.0   ;;  %v5150_v24 = vld [vmem:[#allocation5 + $0x3ec] ss:$48 sps:$4 sm:$0xff]  }
 0x129   :  { %2265 = vmatpush1.bf16.msra.mxu0 %v5151_v6  ;;  %v5156_v6 = vld [vmem:[#allocation5 + $0x44c] ss:$48 sps:$4 sm:$0xff]  }
 0x12a   :  { %2206 = vmatpush1.bf16.msra.mxu1 %v5070_v25  ;;  %2266 = vmatprep.subr.bf16.mxu0 %v5159_v27  ;;  %v382_v25 = vlaneseq }
 0x12b   :  { %2207 = vmatprep.subr.bf16.mxu1 %v5075_v26  ;;  %v5148_v26 = vld [vmem:[#allocation5 + $0x3e8] ss:$48 sps:$4 sm:$0xff]  }
 0x12c   :  { %v5677_v27 = vshrl.u32 %v382_v25, 7 }
 0x12d   :  { %2267 = vmatpush1.bf16.msra.mxu0 %v5157_v30 }
 0x12e   :  { %2208 = vmatpush1.bf16.msra.mxu1 %v5073_v28  ;;  %2268 = vmatprep.subr.bf16.mxu0 %v5165_v31  ;;  %v5154_v28 = vld [vmem:[#allocation5 + $0x448] ss:$48 sps:$4 sm:$0xff]   ;;  %v5680_v30 = vsub.s32 0, %v5677_v27  ;;  %v5682_v31 = vld [vmem:[#allocation7] sm:$0xff] }
 0x12f   :  { %2209 = vmatprep.subr.bf16.mxu1 %v5078_v29  ;;  %v5162_v29 = vld [vmem:[#allocation5 + $0x4ac] ss:$48 sps:$4 sm:$0xff]  }
 0x131   :  { %2269 = vmatpush1.bf16.msra.mxu0 %v5163_v34  ;;  %v5168_v34 = vld [vmem:[#allocation5 + $0x50c] ss:$48 sps:$4 sm:$0xff]  }
 0x132   :  { %2210 = vmatpush1.bf16.msra.mxu1 %v5076_v32  ;;  %2270 = vmatprep.subr.bf16.mxu0 %v5171_v36  ;;  %v5685_v32 = vsub.s32 1, %v5677_v27  ;;  %v385_v36 = vrot.slane %v5682_v31, %v5680_v30 }
 0x133   :  { %2211 = vmatprep.subr.bf16.mxu1 %v5081_v33  ;;  %v5160_v33 = vld [vmem:[#allocation5 + $0x4a8] ss:$48 sps:$4 sm:$0xff]  }
 0x135   :  { %2271 = vmatpush1.bf16.msra.mxu0 %v5169_v39  ;;  %v5174_v39 = vld [vmem:[#allocation5 + $0x56c] ss:$48 sps:$4 sm:$0xff]  }
 0x136   :  { %2212 = vmatpush1.bf16.msra.mxu1 %v5079_v37  ;;  %2272 = vmatprep.subr.bf16.mxu0 %v5177_v40  ;;  %v389_v37 = vrot.slane %v5682_v31, %v5685_v32 }
 0x137   :  { %2213 = vmatprep.subr.bf16.mxu1 %v5084_v38  ;;  %v5166_v38 = vld [vmem:[#allocation5 + $0x508] ss:$48 sps:$4 sm:$0xff]  }
 0x139   :  { %2273 = vmatpush1.bf16.msra.mxu0 %v5175_v43 }
 0x13a   :  { %2214 = vmatpush1.bf16.msra.mxu1 %v5082_v41  ;;  %2285 = vmatprep.subr.bf16.mxu0 %v5183_v44 }
 0x13b   :  { %2328 = vmatprep.subr.bf16.mxu1 %v5090_v42 }
 0x13c   :  { %2275 = vmatmul.mubr.bf16.vlgmr.msra.gmra.mrb[8].mxu0 %v5661_v54 }
 0x13d   :  { %2232 = vmatmul.mubr.bf16.vlgmr.msra.gmra.mrb[8].mxu1 %v5658_v50  ;;  %2286 = vmatpush1.bf16.msra.mxu0 %v5181_v47 }
 0x13e   :  { %2329 = vmatpush1.bf16.msra.mxu1 %v5088_v45  ;;  %2360 = vmatprep.mubr.bf16.mxu1 %v5391_v35  ;;  %v5172_v45 = vld [vmem:[#allocation5 + $0x568] ss:$48 sps:$4 sm:$0xff]  }
 0x13f   :  { %2330 = vmatprep.subr.bf16.mxu1 %v5096_v46  ;;  %2287 = vmatprep.subr.bf16.mxu0 %v5189_v49  ;;  %v5180_v49 = vld [vmem:[#allocation5 + $0x5cc] ss:$48 sps:$4 sm:$0xff]   ;;  %v5178_v35 = vld [vmem:[#allocation5 + $0x5c8] ss:$48 sps:$4 sm:$0xff]  }
 0x140   :  { %2317 = vmatprep.mubr.bf16.mxu0 %v5541_v0 }
 0x141   :  { %2288 = vmatpush1.bf16.msra.mxu0 %v5187_v53 }
 0x142   :  { %2331 = vmatpush1.bf16.msra.mxu1 %v5094_v48  ;;  %2289 = vmatprep.subr.bf16.mxu0 %v5195_v55 }
 0x143   :  { %2332 = vmatprep.subr.bf16.mxu1 %v5102_v52 }
 0x145   :  { %2290 = vmatpush1.bf16.msra.mxu0 %v5193_v58  ;;  %v5184_v58 = vld [vmem:[#allocation5 + $0x628] ss:$48 sps:$4 sm:$0xff]  }
 0x146   :  { %2333 = vmatpush1.bf16.msra.mxu1 %v5100_v56  ;;  %2291 = vmatprep.subr.bf16.mxu0 %v5201_v59  ;;  %v5192_v59 = vld [vmem:[#allocation5 + $0x68c] ss:$48 sps:$4 sm:$0xff]  }
 0x147   :  { %2334 = vmatprep.subr.bf16.mxu1 %v5108_v57  ;;  %v5186_v57 = vld [vmem:[#allocation5 + $0x62c] ss:$48 sps:$4 sm:$0xff]  }
 0x149   :  { %2292 = vmatpush1.bf16.msra.mxu0 %v5199_v62  ;;  %v5196_v62 = vld [vmem:[#allocation5 + $0x6e8] ss:$48 sps:$4 sm:$0xff]  }
 0x14a   :  { %2335 = vmatpush1.bf16.msra.mxu1 %v5106_v60  ;;  %2293 = vmatprep.subr.bf16.mxu0 %v5207_v51  ;;  %v5190_v60 = vld [vmem:[#allocation5 + $0x688] ss:$48 sps:$4 sm:$0xff]   ;;  %v5204_v51 = vld [vmem:[#allocation5 + $0x74c] ss:$48 sps:$4 sm:$0xff]  }
 0x14b   :  { %2336 = vmatprep.subr.bf16.mxu1 %v5114_v61  ;;  %v5198_v61 = vld [vmem:[#allocation5 + $0x6ec] ss:$48 sps:$4 sm:$0xff]  }
 0x14d   :  { %2294 = vmatpush1.bf16.msra.mxu0 %v5205_v2  ;;  %v5208_v2 = vld [vmem:[#allocation5 + $0x7a8] ss:$48 sps:$4 sm:$0xff]  }
 0x14e   :  { %2337 = vmatpush1.bf16.msra.mxu1 %v5112_v63  ;;  %2295 = vmatprep.subr.bf16.mxu0 %v5213_v3  ;;  %v5202_v63 = vld [vmem:[#allocation5 + $0x748] ss:$48 sps:$4 sm:$0xff]   ;;  %v5216_v3 = vld [vmem:[#allocation5 + $0x80c] ss:$48 sps:$4 sm:$0xff]  }
 0x14f   :  { %2338 = vmatprep.subr.bf16.mxu1 %v5120_v1  ;;  %v5210_v1 = vld [vmem:[#allocation5 + $0x7ac] ss:$48 sps:$4 sm:$0xff]  }
 0x150   :  { %v5665_v8 = vpop.f32.mrb[0].mxu1 }
 0x151   :  { %v5667_v10 = vpop.f32.mrb[1].mxu1  ;;  %2296 = vmatpush1.bf16.msra.mxu0 %v5211_v7  ;;  %v5226_v7 = vld [vmem:[#allocation5 + $0x8c8] ss:$48 sps:$4 sm:$0xff]  }
 0x152   :  { %v5669_v11 = vpop.f32.mrb[2].mxu1  ;;  %2339 = vmatpush1.bf16.msra.mxu1 %v5118_v4  ;;  %2297 = vmatprep.subr.bf16.mxu0 %v5219_v9  ;;  %v5222_v4 = vld [vmem:[#allocation5 + $0x86c] ss:$48 sps:$4 sm:$0xff]  }
 0x153   :  { %v5671_v13 = vpop.f32.mrb[3].mxu1  ;;  %2340 = vmatprep.subr.bf16.mxu1 %v5126_v5  ;;  %v5228_v5 = vld [vmem:[#allocation5 + $0x8cc] ss:$48 sps:$4 sm:$0xff]  }
 0x155   :  { %2298 = vmatpush1.bf16.msra.mxu0 %v5217_v15 }
 0x156   :  { %2341 = vmatpush1.bf16.msra.mxu1 %v5124_v12  ;;  %2299 = vmatprep.subr.bf16.mxu0 %v5225_v16  ;;  %v400_v12 = vsub.s32 4, %v5677_v27 }
 0x157   :  { %2342 = vmatprep.subr.bf16.mxu1 %v5132_v14 }
 0x158   :  { %v401_v14 = vrot.slane %v5682_v31, %v400_v12 }
 0x159   :  { %2300 = vmatpush1.bf16.msra.mxu0 %v5223_v19 }
 0x15a   :  { %2343 = vmatpush1.bf16.msra.mxu1 %v5130_v17  ;;  %4629 = vmatprep.subr.bf16.mxu0 %v5542_v22 }
 0x15b   :  { %2344 = vmatprep.subr.bf16.mxu1 %v5138_v18 }
 0x15c   :  { %2318 = vmatmul.mubr.bf16.vlgmr.msra.gmra.mrb[8].mxu0 %v5658_v50 }
 0x15d   :  { %4631 = vmatprep.mubr.msk.bf16.mxu0 %vm5543_vm0, %v5542_v22 }
 0x15e   :  { %2345 = vmatpush1.bf16.msra.mxu1 %v5136_v20 }
 0x15f   :  { %2346 = vmatprep.subr.bf16.mxu1 %v5144_v21 }
 0x162   :  { %2347 = vmatpush1.bf16.msra.mxu1 %v5142_v23 }
 0x163   :  { %2348 = vmatprep.subr.bf16.mxu1 %v5150_v24 }
 0x166   :  { %2349 = vmatpush1.bf16.msra.mxu1 %v5148_v26 }
 0x167   :  { %2350 = vmatprep.subr.bf16.mxu1 %v5156_v6 }
 0x16a   :  { %2351 = vmatpush1.bf16.msra.mxu1 %v5154_v28  ;;  %v408_v28 = vsub.s32 6, %v5677_v27 }
 0x16b   :  { %2352 = vmatprep.subr.bf16.mxu1 %v5162_v29  ;;  %v412_v29 = vsub.s32 7, %v5677_v27 }
 0x16e   :  { %2353 = vmatpush1.bf16.msra.mxu1 %v5160_v33  ;;  %v409_v33 = vrot.slane %v5682_v31, %v408_v28 }
 0x16f   :  { %2354 = vmatprep.subr.bf16.mxu1 %v5168_v34  ;;  %v1932_v40 = vpop.f32.mrb[0].mxu0  ;;  %v5731_v34 = vsub.s32 2, %v5677_v27 }
 0x170   :  { %v1933_v41 = vadd.f32 %v1932_v40, %v385_v36  ;;  %v1934_v42 = vpop.f32.mrb[1].mxu0 }
 0x171   :  { %v1935_v43 = vadd.f32 %v1934_v42, %v389_v37  ;;  %v1936_v44 = vpop.f32.mrb[2].mxu0 }
 0x172   :  { %2355 = vmatpush1.bf16.msra.mxu1 %v5166_v38  ;;  %v5692_v46 = vadd.f32 %v5665_v8, %v1933_v41  ;;  %v1937_v47 = vadd.f32 %v1936_v44, %v385_v36  ;;  %v1938_v48 = vpop.f32.mrb[3].mxu0  ;;  %v413_v36 = vrot.slane %v5682_v31, %v412_v29  ;;  %v393_v41 = vrot.slane %v5682_v31, %v5731_v34 }
 0x173   :  { %2356 = vmatprep.subr.bf16.mxu1 %v5174_v39  ;;  %v5695_v52 = vadd.f32 %v5667_v10, %v1935_v43  ;;  %v1939_v53 = vadd.f32 %v1938_v48, %v389_v37  ;;  %v396_v37 = vsub.s32 3, %v5677_v27 }
 0x174   :  { %v5698_v55 = vadd.f32 %v5669_v11, %v1937_v47  ;;  %v2414_v26 = vpack.c.bf16 %v5692_v46, %v5692_v46 }
 0x175   :  { %v5701_v56 = vadd.f32 %v5671_v13, %v1939_v53  ;;  %v404_v13 = vsub.s32 5, %v5677_v27  ;;  %v2415_v6 = vpack.c.bf16 %v5695_v52, %v5695_v52  ;;  %v397_v44 = vrot.slane %v5682_v31, %v396_v37 }
 0x176   :  { %2357 = vmatpush1.bf16.msra.mxu1 %v5172_v45 }
 0x177   :  { %2358 = vmatprep.subr.bf16.mxu1 %v5180_v49  ;;  %v405_v15 = vrot.slane %v5682_v31, %v404_v13 }
 0x17a   :  { %2359 = vmatpush1.bf16.msra.mxu1 %v5178_v35 }
 0x17b   :  { %2371 = vmatprep.subr.bf16.mxu1 %v5186_v57 }
 0x17d   :  { %2361 = vmatmul.mubr.bf16.vlgmr.msra.gmra.mrb[12].mxu1 %v5661_v54  ;;  %v5214_v54 = vld [vmem:[#allocation5 + $0x808] ss:$48 sps:$4 sm:$0xff]  }
 0x17e   :  { %2372 = vmatpush1.bf16.msra.mxu1 %v5184_v58  ;;  %2403 = vmatprep.mubr.bf16.mxu1 %v5541_v0  ;;  %v5220_v0 = vld [vmem:[#allocation5 + $0x868] ss:$48 sps:$4 sm:$0xff]  }
 0x17f   :  { %2373 = vmatprep.subr.bf16.mxu1 %v5192_v59  ;;  %v2418_v59 = vpack.c.bf16 %v5698_v55, %v5698_v55 }
 0x182   :  { %2374 = vmatpush1.bf16.msra.mxu1 %v5190_v60  ;;  %v2419_v60 = vpack.c.bf16 %v5701_v56, %v5701_v56 }
 0x183   :  { %2375 = vmatprep.subr.bf16.mxu1 %v5198_v61 }
 0x186   :  { %2376 = vmatpush1.bf16.msra.mxu1 %v5196_v62 }
 0x187   :  { %2377 = vmatprep.subr.bf16.mxu1 %v5204_v51 }
 0x18a   :  { %2378 = vmatpush1.bf16.msra.mxu1 %v5202_v63 }
 0x18b   :  { %2379 = vmatprep.subr.bf16.mxu1 %v5210_v1  ;;  %v379_v1 = vld [vmem:[#allocation7 + $0x8] sm:$0xf] }
 0x18e   :  { %2380 = vmatpush1.bf16.msra.mxu1 %v5208_v2  ;;  %v417_v2 = vrot.slane %v379_v1, %v5680_v30 }
 0x18f   :  { %2381 = vmatprep.subr.bf16.mxu1 %v5216_v3  ;;  %v421_v3 = vrot.slane %v379_v1, %v5685_v32 }
 0x192   :  { %2382 = vmatpush1.bf16.msra.mxu1 %v5214_v54 }
 0x193   :  { %2383 = vmatprep.subr.bf16.mxu1 %v5222_v4 }
 0x196   :  { %2384 = vmatpush1.bf16.msra.mxu1 %v5220_v0 }
 0x197   :  { %2385 = vmatprep.subr.bf16.mxu1 %v5228_v5 }
 0x19a   :  { %2386 = vmatpush1.bf16.msra.mxu1 %v5226_v7 }
 0x19b   :  { %4635 = vmatprep.subr.bf16.mxu1 %v5542_v22 }
 0x19d   :  { %2404 = vmatmul.mubr.bf16.vlgmr.msra.gmra.mrb[12].mxu1 %v5658_v50 }
 0x19e   :  { %4637 = vmatprep.mubr.msk.bf16.mxu1 %vm5543_vm0, %v5542_v22 }
 0x1b0   :  { %v2061_v8 = vpop.f32.mrb[4].mxu1 }
 0x1b1   :  { %v2063_v9 = vpop.f32.mrb[5].mxu1  ;;  %v4733_v48 = vadd.f32 %v2061_v8, %v393_v41 }
 0x1b2   :  { %v5709_v10 = vpop.f32.mrb[6].mxu1  ;;  %v4734_v49 = vadd.f32 %v2063_v9, %v397_v44 }
 0x1b3   :  { %v5711_v11 = vpop.f32.mrb[7].mxu1  ;;  %v2416_v52 = vpack.c.bf16 %v4733_v48, %v4733_v48  ;;  %v4735_v51 = vadd.f32 %v5709_v10, %v393_v41 }
 0x1b4   :  { %v2417_v53 = vpack.c.bf16 %v4734_v49, %v4734_v49  ;;  %v4736_v63 = vadd.f32 %v5711_v11, %v397_v44 }
 0x1b5   :  { %v2420_v55 = vpack.c.bf16 %v4735_v51, %v4735_v51 }
 0x1b6   :  { %v2421_v56 = vpack.c.bf16 %v4736_v63, %v4736_v63 }
 0x1cf   :  { %v2147_v16 = vpop.f32.mrb[4].mxu0 }
 0x1d0   :  { %v4737_v17 = vadd.f32 %v2147_v16, %v401_v14  ;;  %v2149_v50 = vpop.f32.mrb[5].mxu0 }
 0x1d1   :  { %v4738_v18 = vadd.f32 %v2149_v50, %v405_v15  ;;  %v2151_v19 = vpop.f32.mrb[6].mxu0 }
 0x1d2   :  { %v2422_v20 = vpack.c.bf16 %v4737_v17, %v4737_v17  ;;  %v4739_v21 = vadd.f32 %v2151_v19, %v401_v14  ;;  %v2153_v23 = vpop.f32.mrb[7].mxu0  ;;  %v5781_v17 = vrot.slane %v379_v1, %v396_v37 }
 0x1d3   :  { %v2423_v24 = vpack.c.bf16 %v4738_v18, %v4738_v18  ;;  %v4740_v25 = vadd.f32 %v2153_v23, %v405_v15  ;;  %v5775_v15 = vrot.slane %v379_v1, %v5731_v34 }
 0x1d4   :  { %4630 = vmatpush3.bf16.xpose.msra.mxu0 %v2422_v20  ;;  %v2426_v35 = vpack.c.bf16 %v4739_v21, %v4739_v21 }
 0x1d5   :  { %4636 = vmatpush3.bf16.xpose.msra.mxu1 %v2423_v24  ;;  %4641 = vmatprep.subr.bf16.mxu0 %v5542_v22  ;;  %v2427_v57 = vpack.c.bf16 %v4740_v25, %v4740_v25 }
 0x1d6   :  { %4647 = vmatprep.subr.bf16.mxu1 %v5542_v22 }
 0x1db   :  { %4632 = vmatmul.mubr.bf16.vlgmr.msra.gmra.mrb[12].mxu0 %v2414_v26 }
 0x1dc   :  { %4638 = vmatmul.mubr.bf16.vlgmr.msra.gmra.mrb[16].mxu1 %v2415_v6  ;;  %4643 = vmatprep.mubr.msk.bf16.mxu0 %vm5543_vm0, %v5542_v22 }
 0x1dd   :  { %4649 = vmatprep.mubr.msk.bf16.mxu1 %vm5543_vm0, %v5542_v22 }
 0x210   :  { %v2233_v38 = vpop.f32.mrb[8].mxu1 }
 0x211   :  { %v4741_v39 = vadd.f32 %v2233_v38, %v409_v33  ;;  %v2235_v40 = vpop.f32.mrb[9].mxu1 }
 0x212   :  { %v4742_v42 = vadd.f32 %v2235_v40, %v413_v36  ;;  %v2237_v43 = vpop.f32.mrb[10].mxu1 }
 0x213   :  { %v2424_v45 = vpack.c.bf16 %v4741_v39, %v4741_v39  ;;  %v2239_v46 = vpop.f32.mrb[11].mxu1  ;;  %v4743_v31 = vadd.f32 %v2237_v43, %v409_v33 }
 0x214   :  { %v2425_v47 = vpack.c.bf16 %v4742_v42, %v4742_v42  ;;  %v4744_v58 = vadd.f32 %v2239_v46, %v413_v36 }
 0x215   :  { %4642 = vmatpush3.bf16.xpose.msra.mxu0 %v2424_v45  ;;  %v2428_v61 = vpack.c.bf16 %v4743_v31, %v4743_v31 }
 0x216   :  { %4648 = vmatpush3.bf16.xpose.msra.mxu1 %v2425_v47  ;;  %4653 = vmatprep.subr.bf16.mxu0 %v5542_v22  ;;  %v2429_v62 = vpack.c.bf16 %v4744_v58, %v4744_v58 }
 0x217   :  { %4659 = vmatprep.subr.bf16.mxu1 %v5542_v22 }
 0x21c   :  { %4644 = vmatmul.mubr.bf16.vlgmr.msra.gmra.mrb[16].mxu0 %v2416_v52 }
 0x21d   :  { %4650 = vmatmul.mubr.bf16.vlgmr.msra.gmra.mrb[20].mxu1 %v2417_v53  ;;  %4654 = vmatpush3.bf16.xpose.msra.mxu0 %v2426_v35 }
 0x21e   :  { %4660 = vmatpush3.bf16.xpose.msra.mxu1 %v2427_v57  ;;  %4655 = vmatprep.mubr.msk.bf16.mxu0 %vm5543_vm0, %v5542_v22 }
 0x21f   :  { %4661 = vmatprep.mubr.msk.bf16.mxu1 %vm5543_vm0, %v5542_v22  ;;  %4665 = vmatprep.subr.bf16.mxu0 %v5542_v22 }
 0x220   :  { %4671 = vmatprep.subr.bf16.mxu1 %v5542_v22 }
 0x224   :  { %4656 = vmatmul.mubr.bf16.vlgmr.msra.gmra.mrb[20].mxu0 %v2418_v59 }
 0x225   :  { %4662 = vmatmul.mubr.bf16.vlgmr.msra.gmra.mrb[24].mxu1 %v2419_v60  ;;  %4666 = vmatpush3.bf16.xpose.msra.mxu0 %v2428_v61 }
 0x226   :  { %4672 = vmatpush3.bf16.xpose.msra.mxu1 %v2429_v62  ;;  %4667 = vmatprep.mubr.msk.bf16.mxu0 %vm5543_vm0, %v5542_v22 }
 0x227   :  { %4673 = vmatprep.mubr.msk.bf16.mxu1 %vm5543_vm0, %v5542_v22  ;;  %4677 = vmatprep.subr.bf16.mxu0 %v5542_v22 }
 0x228   :  { %4683 = vmatprep.subr.bf16.mxu1 %v5542_v22 }
 0x22c   :  { %4668 = vmatmul.mubr.bf16.vlgmr.msra.gmra.mrb[24].mxu0 %v2420_v55 }
 0x22d   :  { %4674 = vmatmul.mubr.bf16.vlgmr.msra.gmra.mrb[28].mxu1 %v2421_v56  ;;  %4679 = vmatprep.mubr.msk.bf16.mxu0 %vm5543_vm0, %v5542_v22 }
 0x22e   :  { %4685 = vmatprep.mubr.msk.bf16.mxu1 %vm5543_vm0, %v5542_v22 }
 0x22f   :  { %v2319_v54 = vpop.f32.mrb[8].mxu0 }
 0x230   :  { %v4745_v4 = vadd.f32 %v2319_v54, %v417_v2  ;;  %v2321_v0 = vpop.f32.mrb[9].mxu0 }
 0x231   :  { %v4746_v5 = vadd.f32 %v2321_v0, %v421_v3  ;;  %v2323_v7 = vpop.f32.mrb[10].mxu0 }
 0x232   :  { %v2430_v8 = vpack.c.bf16 %v4745_v4, %v4745_v4  ;;  %v5766_v9 = vadd.f32 %v2323_v7, %v417_v2  ;;  %v2325_v10 = vpop.f32.mrb[11].mxu0 }
 0x233   :  { %v2431_v11 = vpack.c.bf16 %v4746_v5, %v4746_v5  ;;  %v5768_v12 = vadd.f32 %v2325_v10, %v421_v3 }
 0x234   :  { %v2860_v13 = vsel %vm2858_vm1, %v2430_v8, 0 }
 0x235   :  { %v2906_v14 = vsel %vm2858_vm1, %v2431_v11, 0  ;;  %4678 = vmatpush3.bf16.msra.mxu0 %v2860_v13 }
 0x236   :  { %4684 = vmatpush3.bf16.msra.mxu1 %v2906_v14  ;;  %4689 = vmatprep.subr.bf16.mxu0 %v5542_v22 }
 0x237   :  { %4695 = vmatprep.subr.bf16.mxu1 %v5542_v22 }
 0x270   :  { %v5777_v16 = vpop.f32.mrb[12].mxu1 }
 0x271   :  { %v5783_v50 = vpop.f32.mrb[13].mxu1 }
 0x272   :  { %v2409_v18 = vpop.f32.mrb[14].mxu1 }
 0x273   :  { %v5786_v19 = vadd.f32 %v2409_v18, %v5775_v15  ;;  %v2411_v20 = vpop.f32.mrb[15].mxu1 }
 0x274   :  { %v5789_v21 = vadd.f32 %v2411_v20, %v5781_v17 }
 0x2ae   :  { %v2472_v23 = vpop.f32.mrb[12].mxu0 }
 0x2af   :  { %v4633_v24 = vpop.f32.mrb[13].mxu0  ;;  %v2512_v25 = vpop.f32.mrb[16].mxu1  ;;  %v2759_v37 = vsel %vm2758_vm2, %v2472_v23, -inf }
 0x2b0   :  { %v2475_v26 = vpop.f32.mrb[14].mxu0  ;;  %v4639_v6 = vpop.f32.mrb[17].mxu1  ;;  %v2762_v28 = vsel %vm2758_vm2, %v2512_v25, -inf }
 0x2b1   :  { %2763 = vmax.xlane.f32.xlu0 %v2762_v28  ;;  %v4634_v29 = vpop.f32.mrb[15].mxu0  ;;  %v2515_v33 = vpop.f32.mrb[18].mxu1 }
 0x2b2   :  { %v4640_v36 = vpop.f32.mrb[19].mxu1 }
 0x2b5   :  { %2760 = vmax.xlane.f32.xlu0 %v2759_v37 }
 0x2ef   :  { %v2552_v38 = vpop.f32.mrb[16].mxu0 }
 0x2f0   :  { %v4645_v39 = vpop.f32.mrb[17].mxu0  ;;  %v2592_v40 = vpop.f32.mrb[20].mxu1  ;;  %v2765_v47 = vsel %vm2758_vm2, %v2552_v38, -inf }
 0x2f1   :  { %v2555_v41 = vpop.f32.mrb[18].mxu0  ;;  %v4651_v42 = vpop.f32.mrb[21].mxu1  ;;  %v2768_v43 = vsel %vm2758_vm2, %v2592_v40, -inf }
 0x2f2   :  { %2769 = vmax.xlane.f32.xlu1 %v2768_v43  ;;  %v4646_v44 = vpop.f32.mrb[19].mxu0  ;;  %v2595_v45 = vpop.f32.mrb[22].mxu1 }
 0x2f3   :  { %v4652_v46 = vpop.f32.mrb[23].mxu1 }
 0x2f6   :  { %2766 = vmax.xlane.f32.xlu1 %v2765_v47 }
 0x2f7   :  { %v2632_v48 = vpop.f32.mrb[20].mxu0 }
 0x2f8   :  { %v4657_v49 = vpop.f32.mrb[21].mxu0  ;;  %v2672_v52 = vpop.f32.mrb[24].mxu1  ;;  %v2771_v53 = vsel %vm2758_vm2, %v2632_v48, -inf }
 0x2f9   :  { %v2635_v35 = vpop.f32.mrb[22].mxu0  ;;  %v4663_v57 = vpop.f32.mrb[25].mxu1  ;;  %v2774_v31 = vsel %vm2758_vm2, %v2672_v52, -inf }
 0x2fa   :  { %v2675_v58 = vpop.f32.mrb[26].mxu1  ;;  %2775 = vmax.xlane.f32.xlu0 %v2774_v31  ;;  %2772 = vmax.xlane.f32.xlu1 %v2771_v53  ;;  %v4658_v59 = vpop.f32.mrb[23].mxu0 }
 0x2fb   :  { %v4664_v60 = vpop.f32.mrb[27].mxu1 }
 0x2ff   :  { %v2712_v61 = vpop.f32.mrb[24].mxu0 }
 0x300   :  { %v4669_v62 = vpop.f32.mrb[25].mxu0  ;;  %v2752_v51 = vpop.f32.mrb[28].mxu1  ;;  %v2777_v63 = vsel %vm2758_vm2, %v2712_v61, -inf }
 0x301   :  { %v4675_v55 = vpop.f32.mrb[29].mxu1  ;;  %2778 = vmax.xlane.f32.xlu1 %v2777_v63  ;;  %v2715_v56 = vpop.f32.mrb[26].mxu0  ;;  %v2780_v1 = vsel %vm2758_vm2, %v2752_v51, -inf  ;;  %v4750_v62 = vadd.f32 %v5783_v50, %v5781_v17  ;;  %v4749_v63 = vadd.f32 %v5777_v16, %v5775_v15 }
 0x302   :  { %v2755_v2 = vpop.f32.mrb[30].mxu1  ;;  %2781 = vmax.xlane.f32.xlu0 %v2780_v1  ;;  %v4670_v3 = vpop.f32.mrb[27].mxu0 }
 0x303   :  { %v4676_v54 = vpop.f32.mrb[31].mxu1  ;;  %v2433_v55 = vpack.c.bf16 %v4750_v62, %v4750_v62  ;;  %v2432_v3 = vpack.c.bf16 %v4749_v63, %v4749_v63  ;;  %v5250_v62 = vld [vmem:[#allocation8 + $0xa8] ss:$12 sps:$4 sm:$0xff]   ;;  %v5253_v63 = vld [vmem:[#allocation8 + $0xc0] ss:$12 sps:$4 sm:$0xff]  }
 0x305   :  { %v2998_v54 = vsel %vm2858_vm1, %v2433_v55, 0  ;;  %v2952_v17 = vsel %vm2858_vm1, %v2432_v3, 0  ;;  %v5257_v55 = vld [vmem:[#allocation8 + $0x8] ss:$12 sps:$4 sm:$0xff]   ;;  %v5262_v3 = vld [vmem:[#allocation8 + $0x20] ss:$12 sps:$4 sm:$0xff]  }
 0x33e   :  { %v2764_v4 = vpop.xlane.xlu0 %2763 }
 0x33f   :  { %v2784_v0 = vsub.f32 %v2512_v25, %v2764_v4 }
 0x341   :  { %v2793_v5 = vmul.f32 1.442695, %v2784_v0 }
 0x342   :  { %v2761_v7 = vpop.xlane.xlu0 %2760 }
 0x343   :  { %5357 = vpow2.f32 %v2793_v5  ;;  %v2783_v8 = vsub.f32 %v2472_v23, %v2761_v7 }
 0x345   :  { %v2791_v10 = vmul.f32 1.442695, %v2783_v8  ;;  %v2435_v8 = vpack.c.bf16 %v5768_v12, %v5768_v12 }
 0x347   :  { %5359 = vpow2.f32 %v2791_v10 }
 0x34d   :  { %v5358_v11 = vpop.eup %5357 }
 0x34e   :  { %v2810_v13 = vsel %vm2758_vm2, %v5358_v11, 0.0 }
 0x34f   :  { %2811 = vadd.xlane.f32.xlu0 %v2810_v13 }
 0x351   :  { %v5360_v14 = vpop.eup %5359 }
 0x352   :  { %v2807_v18 = vsel %vm2758_vm2, %v5360_v14, 0.0 }
 0x353   :  { %2808 = vadd.xlane.f32.xlu1 %v2807_v18  ;;  %v2434_v18 = vpack.c.bf16 %v5766_v9, %v5766_v9  ;;  %v2437_v9 = vpack.c.bf16 %v5789_v21, %v5789_v21 }
 0x37f   :  { %v2770_v20 = vpop.xlane.xlu1 %2769 }
 0x380   :  { %v2786_v24 = vsub.f32 %v2592_v40, %v2770_v20  ;;  %v3090_v20 = vsel %vm2858_vm1, %v2435_v8, 0  ;;  %v5276_v8 = vld [vmem:[#allocation8 + $0x128] ss:$12 sps:$4 sm:$0xff]  }
 0x382   :  { %v2797_v26 = vmul.f32 1.442695, %v2786_v24 }
 0x383   :  { %v2767_v6 = vpop.xlane.xlu1 %2766 }
 0x384   :  { %5361 = vpow2.f32 %v2797_v26  ;;  %v2785_v25 = vsub.f32 %v2552_v38, %v2767_v6 }
 0x386   :  { %v2795_v28 = vmul.f32 1.442695, %v2785_v25 }
 0x387   :  { %v2776_v29 = vpop.xlane.xlu0 %2775  ;;  %v2773_v33 = vpop.xlane.xlu1 %2772 }
 0x388   :  { %5363 = vpow2.f32 %v2795_v28  ;;  %v2788_v23 = vsub.f32 %v2672_v52, %v2776_v29  ;;  %v2787_v36 = vsub.f32 %v2632_v48, %v2773_v33  ;;  %v3044_v28 = vsel %vm2858_vm1, %v2434_v18, 0  ;;  %v5278_v18 = vld [vmem:[#allocation8 + $0x138] ss:$12 sps:$4 sm:$0xff]  }
 0x38a   :  { %v2801_v37 = vmul.f32 1.442695, %v2788_v23  ;;  %v2799_v39 = vmul.f32 1.442695, %v2787_v36  ;;  %v2436_v36 = vpack.c.bf16 %v5786_v19, %v5786_v19 }
 0x38c   :  { %5365 = vpow2.f32 %v2801_v37  ;;  %v3182_v37 = vsel %vm2858_vm1, %v2437_v9, 0  ;;  %v5288_v9 = vld [vmem:[#allocation8 + $0x168] ss:$12 sps:$4 sm:$0xff]  }
 0x38d   :  { %5367 = vpow2.f32 %v2799_v39 }
 0x38e   :  { %v5362_v41 = vpop.eup %5361  ;;  %v2779_v42 = vpop.xlane.xlu1 %2778 }
 0x38f   :  { %v2789_v43 = vsub.f32 %v2712_v61, %v2779_v42  ;;  %v2782_v44 = vpop.xlane.xlu0 %2781  ;;  %v2816_v40 = vsel %vm2758_vm2, %v5362_v41, 0.0  ;;  %v3136_v42 = vsel %vm2858_vm1, %v2436_v36, 0 }
 0x390   :  { %v2790_v45 = vsub.f32 %v2752_v51, %v2782_v44  ;;  %2817 = vadd.xlane.f32.xlu0 %v2816_v40 }
 0x391   :  { %v2803_v46 = vmul.f32 1.442695, %v2789_v43 }
 0x392   :  { %v5364_v38 = vpop.eup %5363  ;;  %v2805_v47 = vmul.f32 1.442695, %v2790_v45  ;;  %v5229_v45 = vld [vmem:[#allocation8] ss:$12 sps:$4 sm:$0xff]  }
 0x393   :  { %5369 = vpow2.f32 %v2803_v46  ;;  %v2813_v49 = vsel %vm2758_vm2, %v5364_v38, 0.0  ;;  %v5231_v46 = vld [vmem:[#allocation8 + $0x4] ss:$12 sps:$4 sm:$0xff]  }
 0x394   :  { %5371 = vpow2.f32 %v2805_v47  ;;  %2814 = vadd.xlane.f32.xlu1 %v2813_v49  ;;  %v5232_v47 = vld [vmem:[#allocation8 + $0x18] ss:$12 sps:$4 sm:$0xff]   ;;  %v5237_v49 = vld [vmem:[#allocation8 + $0x34] ss:$12 sps:$4 sm:$0xff]  }
 0x396   :  { %v5803_v48 = vpop.eup %5365 }
 0x397   :  { %v5805_v52 = vpop.eup %5367  ;;  %v2822_v53 = vsel %vm2758_vm2, %v5803_v48, 0.0 }
 0x398   :  { %2823 = vadd.xlane.f32.xlu0 %v2822_v53  ;;  %v2819_v35 = vsel %vm2758_vm2, %v5805_v52, 0.0  ;;  %v5238_v53 = vld [vmem:[#allocation8 + $0x48] ss:$12 sps:$4 sm:$0xff]  }
 0x399   :  { %2820 = vadd.xlane.f32.xlu1 %v2819_v35  ;;  %v5243_v35 = vld [vmem:[#allocation8 + $0x64] ss:$12 sps:$4 sm:$0xff]  }
 0x39d   :  { %v5811_v57 = vpop.eup %5369 }
 0x39e   :  { %v5813_v31 = vpop.eup %5371  ;;  %v2825_v58 = vsel %vm2758_vm2, %v5811_v57, 0.0 }
 0x39f   :  { %2826 = vadd.xlane.f32.xlu1 %v2825_v58  ;;  %v2828_v59 = vsel %vm2758_vm2, %v5813_v31, 0.0  ;;  %v5244_v58 = vld [vmem:[#allocation8 + $0x78] ss:$12 sps:$4 sm:$0xff]  }
 0x3a0   :  { %2829 = vadd.xlane.f32.xlu0 %v2828_v59  ;;  %v5249_v59 = vld [vmem:[#allocation8 + $0x94] ss:$12 sps:$4 sm:$0xff]  }
 0x3dc   :  { %v2812_v60 = vpop.xlane.xlu0 %2811 }
 0x3dd   :  { %5373 = vrcp.f32 %v2812_v60  ;;  %v5247_v60 = vld [vmem:[#allocation8 + $0x90] ss:$12 sps:$4 sm:$0xff]  }
 0x3e0   :  { %v2809_v61 = vpop.xlane.xlu1 %2808 }
 0x3e1   :  { %5375 = vrcp.f32 %v2809_v61  ;;  %v5252_v61 = vld [vmem:[#allocation8 + $0xac] ss:$12 sps:$4 sm:$0xff]  }
 0x3e7   :  { %v5374_v51 = vpop.eup %5373 }
 0x3e8   :  { %v2834_v56 = vmul.f32 %v5374_v51, %v5358_v11  ;;  %v5255_v51 = vld [vmem:[#allocation8 + $0xc4] ss:$12 sps:$4 sm:$0xff]  }
 0x3ea   :  { %v2848_v1 = vpack.c.bf16 %v2834_v56, %v2834_v56  ;;  %v5260_v56 = vld [vmem:[#allocation8 + $0xdc] ss:$12 sps:$4 sm:$0xff]  }
 0x3eb   :  { %v5376_v2 = vpop.eup %5375 }
 0x3ec   :  { %v2832_v4 = vmul.f32 %v5376_v2, %v5360_v14  ;;  %4686 = vmatmul.mubr.msk.bf16.vlgmr.msra.gmra.mrb[32].mxu1 %vm2758_vm2, %v2848_v1  ;;  %v5261_v1 = vld [vmem:[#allocation8 + $0xe0] ss:$12 sps:$4 sm:$0xff]   ;;  %v5258_v2 = vld [vmem:[#allocation8 + $0xd8] ss:$12 sps:$4 sm:$0xff]  }
 0x3ed   :  { %4696 = vmatpush3.bf16.msra.mxu1 %v2998_v54  ;;  %4697 = vmatprep.mubr.msk.bf16.mxu1 %vm5543_vm0, %v5542_v22  ;;  %v5265_v54 = vld [vmem:[#allocation8 + $0xf4] ss:$12 sps:$4 sm:$0xff]  }
 0x3ee   :  { %v2847_v0 = vpack.c.bf16 %v2832_v4, %v2832_v4  ;;  %4707 = vmatprep.subr.bf16.mxu1 %v5542_v22  ;;  %v5266_v4 = vld [vmem:[#allocation8 + $0xf8] ss:$12 sps:$4 sm:$0xff]  }
 0x3f0   :  { %4680 = vmatmul.mubr.msk.bf16.vlgmr.msra.gmra.mrb[28].mxu0 %vm2758_vm2, %v2847_v0  ;;  %v5263_v0 = vld [vmem:[#allocation8 + $0xf0] ss:$12 sps:$4 sm:$0xff]  }
 0x3f1   :  { %4690 = vmatpush3.bf16.msra.mxu0 %v2952_v17  ;;  %4691 = vmatprep.mubr.msk.bf16.mxu0 %vm5543_vm0, %v5542_v22  ;;  %v5267_v17 = vld [vmem:[#allocation8 + $0x38] ss:$12 sps:$4 sm:$0xff]  }
 0x3f2   :  { %4701 = vmatprep.subr.bf16.mxu0 %v5542_v22 }
 0x41d   :  { %v2818_v15 = vpop.xlane.xlu0 %2817 }
 0x41e   :  { %5377 = vrcp.f32 %v2818_v15  ;;  %v5270_v15 = vld [vmem:[#allocation8 + $0x10c] ss:$12 sps:$4 sm:$0xff]  }
 0x421   :  { %v2815_v16 = vpop.xlane.xlu1 %2814 }
 0x422   :  { %5379 = vrcp.f32 %v2815_v16  ;;  %v5271_v16 = vld [vmem:[#allocation8 + $0x110] ss:$12 sps:$4 sm:$0xff]  }
 0x425   :  { %v2824_v50 = vpop.xlane.xlu0 %2823 }
 0x426   :  { %5381 = vrcp.f32 %v2824_v50  ;;  %v2821_v5 = vpop.xlane.xlu1 %2820  ;;  %v5268_v50 = vld [vmem:[#allocation8 + $0x108] ss:$12 sps:$4 sm:$0xff]  }
 0x427   :  { %5383 = vrcp.f32 %v2821_v5  ;;  %v5272_v5 = vld [vmem:[#allocation8 + $0x50] ss:$12 sps:$4 sm:$0xff]  }
 0x428   :  { %v5378_v7 = vpop.eup %5377 }
 0x429   :  { %v2838_v10 = vmul.f32 %v5378_v7, %v5362_v41  ;;  %v5275_v7 = vld [vmem:[#allocation8 + $0x124] ss:$12 sps:$4 sm:$0xff]  }
 0x42b   :  { %v2850_v11 = vpack.c.bf16 %v2838_v10, %v2838_v10  ;;  %v5273_v10 = vld [vmem:[#allocation8 + $0x120] ss:$12 sps:$4 sm:$0xff]  }
 0x42c   :  { %v5380_v13 = vpop.eup %5379  ;;  %v2827_v14 = vpop.xlane.xlu1 %2826 }
 0x42d   :  { %v2836_v24 = vmul.f32 %v5380_v13, %v5364_v38  ;;  %5385 = vrcp.f32 %v2827_v14  ;;  %4698 = vmatmul.mubr.msk.bf16.vlgmr.msra.gmra.mrb[36].mxu1 %vm2758_vm2, %v2850_v11  ;;  %v2830_v26 = vpop.xlane.xlu0 %2829  ;;  %v5234_v38 = vld [vmem:[#allocation8 + $0x1c] ss:$12 sps:$4 sm:$0xff]   ;;  %v5281_v14 = vld [vmem:[#allocation8 + $0x140] ss:$12 sps:$4 sm:$0xff]  }
 0x42e   :  { %4708 = vmatpush3.bf16.msra.mxu1 %v3090_v20  ;;  %5387 = vrcp.f32 %v2830_v26  ;;  %4709 = vmatprep.mubr.msk.bf16.mxu1 %vm5543_vm0, %v5542_v22  ;;  %v5277_v11 = vld [vmem:[#allocation8 + $0x68] ss:$12 sps:$4 sm:$0xff]   ;;  %v5282_v20 = vld [vmem:[#allocation8 + $0x80] ss:$12 sps:$4 sm:$0xff]   ;;  %v5286_v26 = vld [vmem:[#allocation8 + $0x158] ss:$12 sps:$4 sm:$0xff]  }
 0x42f   :  { %v2849_v12 = vpack.c.bf16 %v2836_v24, %v2836_v24  ;;  %4719 = vmatprep.subr.bf16.mxu1 %v5542_v22  ;;  %v5280_v13 = vld [vmem:[#allocation8 + $0x13c] ss:$12 sps:$4 sm:$0xff]   ;;  %v5285_v24 = vld [vmem:[#allocation8 + $0x154] ss:$12 sps:$4 sm:$0xff]  }
 0x430   :  { %v5382_v6 = vpop.eup %5381 }
 0x431   :  { %v5384_v25 = vpop.eup %5383  ;;  %v2842_v29 = vmul.f32 %v5382_v6, %v5803_v48  ;;  %4692 = vmatmul.mubr.msk.bf16.vlgmr.msra.gmra.mrb[32].mxu0 %vm2758_vm2, %v2849_v12  ;;  %v5256_v48 = vld [vmem:[#allocation8 + $0xc8] ss:$12 sps:$4 sm:$0xff]   ;;  %v5283_v12 = vld [vmem:[#allocation8 + $0x150] ss:$12 sps:$4 sm:$0xff]   ;;  %v5287_v6 = vld [vmem:[#allocation8 + $0x98] ss:$12 sps:$4 sm:$0xff]  }
 0x432   :  { %4702 = vmatpush3.bf16.msra.mxu0 %v3044_v28  ;;  %4703 = vmatprep.mubr.msk.bf16.mxu0 %vm5543_vm0, %v5542_v22  ;;  %v2840_v33 = vmul.f32 %v5384_v25, %v5805_v52  ;;  %v5235_v52 = vld [vmem:[#allocation8 + $0x30] ss:$12 sps:$4 sm:$0xff]   ;;  %v5290_v25 = vld [vmem:[#allocation8 + $0x16c] ss:$12 sps:$4 sm:$0xff]  }
 0x433   :  { %v2852_v23 = vpack.c.bf16 %v2842_v29, %v2842_v29  ;;  %4713 = vmatprep.subr.bf16.mxu0 %v5542_v22  ;;  %v5291_v28 = vld [vmem:[#allocation8 + $0x170] ss:$12 sps:$4 sm:$0xff]  }
 0x434   :  { %v2851_v39 = vpack.c.bf16 %v2840_v33, %v2840_v33  ;;  %v5292_v29 = vld [vmem:[#allocation8 + $0xb0] ss:$12 sps:$4 sm:$0xff]  }
 0x435   :  { %4710 = vmatmul.mubr.msk.bf16.vlgmr.msra.gmra.mrb[40].mxu1 %vm2758_vm2, %v2852_v23  ;;  %v5295_v33 = vld [vmem:[#allocation8 + $0x184] ss:$12 sps:$4 sm:$0xff]   ;;  %v5296_v23 = vld [vmem:[#allocation8 + $0x248] ss:$12 sps:$4 sm:$0xff]  }
 0x436   :  { %4720 = vmatpush3.bf16.msra.mxu1 %v3182_v37  ;;  %4721 = vmatprep.mubr.msk.bf16.mxu1 %vm5543_vm0, %v5542_v22 }
 0x437   :  { %v5386_v21 = vpop.eup %5385  ;;  %4585 = vmatprep.subr.bf16.mxu1 %v5256_v48 }
 0x438   :  { %v5388_v41 = vpop.eup %5387  ;;  %v2844_v19 = vmul.f32 %v5386_v21, %v5811_v57  ;;  %v5241_v57 = vld [vmem:[#allocation8 + $0x60] ss:$12 sps:$4 sm:$0xff]  }
 0x439   :  { %v2846_v43 = vmul.f32 %v5388_v41, %v5813_v31  ;;  %4704 = vmatmul.mubr.msk.bf16.vlgmr.msra.gmra.mrb[36].mxu0 %vm2758_vm2, %v2851_v39  ;;  %v5246_v31 = vld [vmem:[#allocation8 + $0x7c] ss:$12 sps:$4 sm:$0xff]  }
 0x43a   :  { %4714 = vmatpush3.bf16.msra.mxu0 %v3136_v42  ;;  %4715 = vmatprep.mubr.msk.bf16.mxu0 %vm5543_vm0, %v5542_v22  ;;  %v2853_v40 = vpack.c.bf16 %v2844_v19, %v2844_v19  ;;  %v5240_v22 = vld [vmem:[#allocation8 + $0x4c] ss:$12 sps:$4 sm:$0xff]  }
 0x43b   :  { %v2854_v44 = vpack.c.bf16 %v2846_v43, %v2846_v43  ;;  %3958 = vmatprep.subr.bf16.mxu0 %v5231_v46 }
 0x43d   :  { %4722 = vmatmul.mubr.msk.bf16.vlgmr.msra.gmra.mrb[44].mxu1 %vm2758_vm2, %v2854_v44 }
 0x43e   :  { %4586 = vmatpush3.bf16.msra.mxu1 %v5257_v55 }
 0x43f   :  { %4587 = vmatprep.subr.bf16.mxu1 %v5261_v1 }
 0x441   :  { %4716 = vmatmul.mubr.msk.bf16.vlgmr.msra.gmra.mrb[40].mxu0 %vm2758_vm2, %v2853_v40 }
 0x442   :  { %3959 = vmatpush1.bf16.msra.mxu0 %v5229_v45  ;;  %4588 = vmatpush3.bf16.msra.mxu1 %v5262_v3 }
 0x443   :  { %3960 = vmatprep.subr.bf16.mxu0 %v5234_v38  ;;  %4589 = vmatprep.subr.bf16.mxu1 %v5266_v4 }
 0x446   :  { %3961 = vmatpush1.bf16.msra.mxu0 %v5232_v47  ;;  %4590 = vmatpush3.bf16.msra.mxu1 %v5267_v17 }
 0x447   :  { %3962 = vmatprep.subr.bf16.mxu0 %v5237_v49  ;;  %4591 = vmatprep.subr.bf16.mxu1 %v5271_v16 }
 0x44a   :  { %3963 = vmatpush1.bf16.msra.mxu0 %v5235_v52  ;;  %4592 = vmatpush3.bf16.msra.mxu1 %v5272_v5 }
 0x44b   :  { %3964 = vmatprep.subr.bf16.mxu0 %v5240_v22  ;;  %4593 = vmatprep.subr.bf16.mxu1 %v5276_v8 }
 0x44e   :  { %3965 = vmatpush1.bf16.msra.mxu0 %v5238_v53  ;;  %4594 = vmatpush3.bf16.msra.mxu1 %v5277_v11 }
 0x44f   :  { %3966 = vmatprep.subr.bf16.mxu0 %v5243_v35  ;;  %4595 = vmatprep.subr.bf16.mxu1 %v5281_v14 }
 0x452   :  { %3967 = vmatpush1.bf16.msra.mxu0 %v5241_v57  ;;  %4596 = vmatpush3.bf16.msra.mxu1 %v5282_v20 }
 0x453   :  { %3968 = vmatprep.subr.bf16.mxu0 %v5246_v31  ;;  %4597 = vmatprep.subr.bf16.mxu1 %v5286_v26 }
 0x456   :  { %3969 = vmatpush1.bf16.msra.mxu0 %v5244_v58  ;;  %4598 = vmatpush3.bf16.msra.mxu1 %v5287_v6 }
 0x457   :  { %3970 = vmatprep.subr.bf16.mxu0 %v5249_v59  ;;  %4599 = vmatprep.subr.bf16.mxu1 %v5291_v28 }
 0x45a   :  { %3971 = vmatpush1.bf16.msra.mxu0 %v5247_v60  ;;  %4600 = vmatpush3.bf16.msra.mxu1 %v5292_v29 }
 0x45b   :  { %3972 = vmatprep.subr.bf16.mxu0 %v5252_v61  ;;  %4607 = vmatprep.subr.bf16.mxu1 %v5296_v23 }
 0x45e   :  { %3973 = vmatpush1.bf16.msra.mxu0 %v5250_v62 }
 0x45f   :  { %3974 = vmatprep.subr.bf16.mxu0 %v5255_v51 }
 0x462   :  { %3975 = vmatpush1.bf16.msra.mxu0 %v5253_v63 }
 0x463   :  { %3976 = vmatprep.subr.bf16.mxu0 %v5260_v56 }
 0x466   :  { %3977 = vmatpush1.bf16.msra.mxu0 %v5258_v2 }
 0x467   :  { %3978 = vmatprep.subr.bf16.mxu0 %v5265_v54 }
 0x46a   :  { %3979 = vmatpush1.bf16.msra.mxu0 %v5263_v0 }
 0x46b   :  { %3980 = vmatprep.subr.bf16.mxu0 %v5270_v15 }
 0x46e   :  { %3981 = vmatpush1.bf16.msra.mxu0 %v5268_v50 }
 0x46f   :  { %3982 = vmatprep.subr.bf16.mxu0 %v5275_v7 }
 0x472   :  { %3983 = vmatpush1.bf16.msra.mxu0 %v5273_v10 }
 0x473   :  { %3984 = vmatprep.subr.bf16.mxu0 %v5280_v13 }
 0x476   :  { %3985 = vmatpush1.bf16.msra.mxu0 %v5278_v18 }
 0x477   :  { %3986 = vmatprep.subr.bf16.mxu0 %v5285_v24 }
 0x47a   :  { %3987 = vmatpush1.bf16.msra.mxu0 %v5283_v12 }
 0x47b   :  { %3988 = vmatprep.subr.bf16.mxu0 %v5290_v25 }
 0x47e   :  { %3989 = vmatpush1.bf16.msra.mxu0 %v5288_v9 }
 0x47f   :  { %3999 = vmatprep.subr.bf16.mxu0 %v5295_v33 }
 0x4bf   :  { %v2942_v36 = vpop.f32.mrb[32].mxu1 }
 0x4c0   :  { %v4687_v37 = vpop.f32.mrb[33].mxu1  ;;  %v3230_v44 = vrot.slane %v2942_v36, 4 }
 0x4c1   :  { %v2945_v21 = vpop.f32.mrb[34].mxu1 }
 0x4c2   :  { %v4688_v39 = vpop.f32.mrb[35].mxu1  ;;  %v3231_v46 = vadd.f32 %v3230_v44, %v2942_v36 }
 0x4c3   :  { %v2896_v41 = vpop.f32.mrb[28].mxu0 }
 0x4c4   :  { %v4681_v42 = vpop.f32.mrb[29].mxu0  ;;  %v3224_v38 = vrot.slane %v2896_v41, 4  ;;  %v3232_v22 = vrot.slane %v3231_v46, 2 }
 0x4c5   :  { %v2899_v43 = vpop.f32.mrb[30].mxu0 }
 0x4c6   :  { %v4682_v19 = vpop.f32.mrb[31].mxu0  ;;  %v3225_v53 = vadd.f32 %v3224_v38, %v2896_v41  ;;  %v3233_v61 = vadd.f32 %v3232_v22, %v3231_v46 }
 0x4c8   :  { %v3226_v62 = vrot.slane %v3225_v53, 2  ;;  %v3234_v0 = vrot.slane %v3233_v61, 1 }
 0x4ca   :  { %v3227_v17 = vadd.f32 %v3226_v62, %v3225_v53  ;;  %v3235_v20 = vadd.f32 %v3234_v0, %v3233_v61 }
 0x4cc   :  { %v3228_v24 = vrot.slane %v3227_v17, 1  ;;  %v3273_v41 = vmul.f32 0.125, %v3235_v20  ;;  %v5310_v20 = vld [vmem:[#allocation8 + $0x1cc] ss:$12 sps:$4 sm:$0xff]  }
 0x4ce   :  { %v3229_v42 = vadd.f32 %v3228_v24, %v3227_v17  ;;  %v5311_v24 = vld [vmem:[#allocation8 + $0x290] ss:$12 sps:$4 sm:$0xff]  }
 0x4d0   :  { %v3272_v53 = vmul.f32 0.125, %v3229_v42  ;;  %v5330_v42 = vld [vmem:[#allocation8 + $0x22c] ss:$12 sps:$4 sm:$0xff]  }
 0x500   :  { %v3034_v40 = vpop.f32.mrb[36].mxu1 }
 0x501   :  { %v4699_v45 = vpop.f32.mrb[37].mxu1  ;;  %v3242_v35 = vrot.slane %v3034_v40, 4 }
 0x502   :  { %v3037_v47 = vpop.f32.mrb[38].mxu1 }
 0x503   :  { %v4700_v49 = vpop.f32.mrb[39].mxu1  ;;  %v3243_v51 = vadd.f32 %v3242_v35, %v3034_v40 }
 0x504   :  { %v2988_v48 = vpop.f32.mrb[32].mxu0 }
 0x505   :  { %v4693_v52 = vpop.f32.mrb[33].mxu0  ;;  %v3236_v63 = vrot.slane %v2988_v48, 4  ;;  %v3244_v15 = vrot.slane %v3243_v51, 2 }
 0x506   :  { %v2991_v57 = vpop.f32.mrb[34].mxu0 }
 0x507   :  { %v4694_v31 = vpop.f32.mrb[35].mxu0  ;;  %v3237_v16 = vadd.f32 %v3236_v63, %v2988_v48  ;;  %v3245_v26 = vadd.f32 %v3244_v15, %v3243_v51  ;;  %v5293_v51 = vld [vmem:[#allocation8 + $0x180] ss:$12 sps:$4 sm:$0xff]   ;;  %v5298_v15 = vld [vmem:[#allocation8 + $0x198] ss:$12 sps:$4 sm:$0xff]  }
 0x508   :  { %v3126_v58 = vpop.f32.mrb[40].mxu1 }
 0x509   :  { %v3254_v59 = vrot.slane %v3126_v58, 4  ;;  %v4711_v60 = vpop.f32.mrb[41].mxu1  ;;  %v3238_v12 = vrot.slane %v3237_v16, 2  ;;  %v3246_v43 = vrot.slane %v3245_v26, 1 }
 0x50a   :  { %v3129_v55 = vpop.f32.mrb[42].mxu1 }
 0x50b   :  { %v3255_v56 = vadd.f32 %v3254_v59, %v3126_v58  ;;  %v4712_v1 = vpop.f32.mrb[43].mxu1  ;;  %v3239_v19 = vadd.f32 %v3238_v12, %v3237_v16  ;;  %v3247_v35 = vadd.f32 %v3246_v43, %v3245_v26  ;;  %v5297_v55 = vld [vmem:[#allocation8 + $0x188] ss:$12 sps:$4 sm:$0xff]   ;;  %v5312_v12 = vld [vmem:[#allocation8 + $0x1d0] ss:$12 sps:$4 sm:$0xff]  }
 0x50c   :  { %v3080_v2 = vpop.f32.mrb[36].mxu0  ;;  %v5300_v1 = vld [vmem:[#allocation8 + $0x19c] ss:$12 sps:$4 sm:$0xff]  }
 0x50d   :  { %v3256_v3 = vrot.slane %v3255_v56, 2  ;;  %v3248_v54 = vrot.slane %v3080_v2, 4  ;;  %v4705_v4 = vpop.f32.mrb[37].mxu0  ;;  %v3240_v31 = vrot.slane %v3239_v19, 1  ;;  %v5308_v26 = vld [vmem:[#allocation8 + $0x1c8] ss:$12 sps:$4 sm:$0xff]  }
 0x50e   :  { %v3083_v50 = vpop.f32.mrb[38].mxu0  ;;  %v5331_v43 = vld [vmem:[#allocation8 + $0x2f0] ss:$12 sps:$4 sm:$0xff]  }
 0x50f   :  { %v3257_v5 = vadd.f32 %v3256_v3, %v3255_v56  ;;  %v3249_v7 = vadd.f32 %v3248_v54, %v3080_v2  ;;  %v4706_v8 = vpop.f32.mrb[39].mxu0  ;;  %v5301_v2 = vld [vmem:[#allocation8 + $0x260] ss:$12 sps:$4 sm:$0xff]   ;;  %v3275_v3 = vmul.f32 0.125, %v3247_v35  ;;  %v3241_v54 = vadd.f32 %v3240_v31, %v3239_v19  ;;  %v5328_v19 = vld [vmem:[#allocation8 + $0x228] ss:$12 sps:$4 sm:$0xff]  }
 0x510   :  { %v3218_v10 = vpop.f32.mrb[44].mxu1  ;;  %v5302_v50 = vld [vmem:[#allocation8 + $0x1a0] ss:$12 sps:$4 sm:$0xff]   ;;  %v5306_v8 = vld [vmem:[#allocation8 + $0x278] ss:$12 sps:$4 sm:$0xff]  }
 0x511   :  { %v3258_v11 = vrot.slane %v3257_v5, 1  ;;  %v3250_v13 = vrot.slane %v3249_v7, 2  ;;  %v3266_v14 = vrot.slane %v3218_v10, 4  ;;  %v4723_v18 = vpop.f32.mrb[45].mxu1  ;;  %v5345_v35 = vld [vmem:[#allocation8 + $0x2a0] ss:$12 sps:$4 sm:$0xff]  }
 0x512   :  { %v3221_v6 = vpop.f32.mrb[46].mxu1  ;;  %v5348_v31 = vld [vmem:[#allocation8 + $0x2b8] ss:$12 sps:$4 sm:$0xff]  }
 0x513   :  { %v3259_v25 = vadd.f32 %v3258_v11, %v3257_v5  ;;  %v3251_v28 = vadd.f32 %v3250_v13, %v3249_v7  ;;  %v3267_v9 = vadd.f32 %v3266_v14, %v3218_v10  ;;  %v4724_v29 = vpop.f32.mrb[47].mxu1  ;;  %v5305_v7 = vld [vmem:[#allocation8 + $0x1b4] ss:$12 sps:$4 sm:$0xff]   ;;  %v3274_v10 = vmul.f32 0.125, %v3241_v54  ;;  %v5303_v13 = vld [vmem:[#allocation8 + $0x1b0] ss:$12 sps:$4 sm:$0xff]  }
 0x514   :  { %v3172_v33 = vpop.f32.mrb[40].mxu0  ;;  %v5307_v14 = vld [vmem:[#allocation8 + $0x1b8] ss:$12 sps:$4 sm:$0xff]   ;;  %v5320_v29 = vld [vmem:[#allocation8 + $0x1fc] ss:$12 sps:$4 sm:$0xff]  }
 0x515   :  { %v3277_v23 = vmul.f32 0.125, %v3259_v25  ;;  %v3252_v36 = vrot.slane %v3251_v28, 1  ;;  %v3268_v37 = vrot.slane %v3267_v9, 2  ;;  %v3260_v21 = vrot.slane %v3172_v33, 4  ;;  %v4717_v39 = vpop.f32.mrb[41].mxu0 }
 0x516   :  { %v3175_v44 = vpop.f32.mrb[42].mxu0  ;;  %v5315_v6 = vld [vmem:[#allocation8 + $0x1e4] ss:$12 sps:$4 sm:$0xff]   ;;  %v5316_v25 = vld [vmem:[#allocation8 + $0x2a8] ss:$12 sps:$4 sm:$0xff]  }
 0x517   :  { %v3285_v40 = vrot.slane %v3277_v23, 7  ;;  %v3253_v45 = vadd.f32 %v3252_v36, %v3251_v28  ;;  %v3269_v46 = vadd.f32 %v3268_v37, %v3267_v9  ;;  %v3261_v38 = vadd.f32 %v3260_v21, %v3172_v33  ;;  %v4718_v47 = vpop.f32.mrb[43].mxu0  ;;  %v5313_v28 = vld [vmem:[#allocation8 + $0x1e0] ss:$12 sps:$4 sm:$0xff]   ;;  %v5317_v9 = vld [vmem:[#allocation8 + $0x1e8] ss:$12 sps:$4 sm:$0xff]  }
 0x518   :  { %v5321_v33 = vld [vmem:[#allocation8 + $0x2c0] ss:$12 sps:$4 sm:$0xff]   ;;  %v5318_v23 = vld [vmem:[#allocation8 + $0x1f8] ss:$12 sps:$4 sm:$0xff]   ;;  %v5323_v39 = vld [vmem:[#allocation8 + $0x210] ss:$12 sps:$4 sm:$0xff]  }
 0x519   :  { %v3276_v49 = vmul.f32 0.125, %v3253_v45  ;;  %v3270_v48 = vrot.slane %v3269_v46, 1  ;;  %v3262_v52 = vrot.slane %v3261_v38, 2  ;;  %v3294_v22 = vsel %vm3292_vm3, %v3273_v41, %v3285_v40  ;;  %v5322_v36 = vld [vmem:[#allocation8 + $0x200] ss:$12 sps:$4 sm:$0xff]  }
 0x51a   :  { %v3298_v57 = vpack.c.bf16 %v3294_v22, %v3294_v22  ;;  %v5325_v37 = vld [vmem:[#allocation8 + $0x214] ss:$12 sps:$4 sm:$0xff]   ;;  %v5326_v21 = vld [vmem:[#allocation8 + $0x2d8] ss:$12 sps:$4 sm:$0xff]   ;;  %v5332_v44 = vld [vmem:[#allocation8 + $0x230] ss:$12 sps:$4 sm:$0xff]  }
 0x51b   :  { %v3284_v58 = vrot.slane %v3276_v49, 7  ;;  %v3271_v59 = vadd.f32 %v3270_v48, %v3269_v46  ;;  %v3263_v60 = vadd.f32 %v3262_v52, %v3261_v38  ;;  %v5327_v41 = vld [vmem:[#allocation8 + $0x218] ss:$12 sps:$4 sm:$0xff]   ;;  %v5333_v45 = vld [vmem:[#allocation8 + $0x240] ss:$12 sps:$4 sm:$0xff]  }
 0x51c   :  { %3990 = vmatprep.mubr.bf16.mxu0 %v3298_v57  ;;  %4072 = vmatprep.mubr.bf16.mxu1 %v3298_v57  ;;  %v5335_v40 = vld [vmem:[#allocation8 + $0x244] ss:$12 sps:$4 sm:$0xff]   ;;  %v5338_v38 = vld [vmem:[#allocation8 + $0x25c] ss:$12 sps:$4 sm:$0xff]   ;;  %v5341_v49 = vld [vmem:[#allocation8 + $0x274] ss:$12 sps:$4 sm:$0xff]  }
 0x51d   :  { %v3279_v61 = vmul.f32 0.125, %v3271_v59  ;;  %v3264_v62 = vrot.slane %v3263_v60, 1  ;;  %v3293_v63 = vsel %vm3292_vm3, %v3272_v53, %v3284_v58  ;;  %v5336_v47 = vld [vmem:[#allocation8 + $0x258] ss:$12 sps:$4 sm:$0xff]   ;;  %v5339_v48 = vld [vmem:[#allocation8 + $0x270] ss:$12 sps:$4 sm:$0xff]  }
 0x51e   :  { %v3297_v56 = vpack.c.bf16 %v3293_v63, %v3293_v63  ;;  %v5344_v52 = vld [vmem:[#allocation8 + $0x28c] ss:$12 sps:$4 sm:$0xff]   ;;  %v5342_v22 = vld [vmem:[#allocation8 + $0x288] ss:$12 sps:$4 sm:$0xff]   ;;  %v5347_v53 = vld [vmem:[#allocation8 + $0x2a4] ss:$12 sps:$4 sm:$0xff]  }
 0x51f   :  { %v3287_v4 = vrot.slane %v3279_v61, 7  ;;  %v3265_v0 = vadd.f32 %v3264_v62, %v3263_v60  ;;  %v5350_v57 = vld [vmem:[#allocation8 + $0x2bc] ss:$12 sps:$4 sm:$0xff]   ;;  %v5353_v58 = vld [vmem:[#allocation8 + $0x2d4] ss:$12 sps:$4 sm:$0xff]  }
 0x520   :  { %3991 = vmatmul.mubr.bf16.vlgmr.msra.gmra.mrb[44].mxu0 %v3297_v56  ;;  %4073 = vmatmul.mubr.bf16.vlgmr.msra.gmra.mrb[48].mxu1 %v3297_v56  ;;  %v5351_v59 = vld [vmem:[#allocation8 + $0x2d0] ss:$12 sps:$4 sm:$0xff]   ;;  %v5356_v60 = vld [vmem:[#allocation8 + $0x2ec] ss:$12 sps:$4 sm:$0xff]   ;;  %v5354_v61 = vld [vmem:[#allocation8 + $0x2e8] ss:$12 sps:$4 sm:$0xff]  }
 0x521   :  { %v3278_v17 = vmul.f32 0.125, %v3265_v0  ;;  %4000 = vmatpush1.bf16.msra.mxu0 %v5293_v51  ;;  %4608 = vmatpush3.bf16.msra.mxu1 %v5297_v55  ;;  %v3296_v16 = vsel %vm3292_vm3, %v3275_v3, %v3287_v4 }
 0x522   :  { %4001 = vmatprep.subr.bf16.mxu0 %v5300_v1  ;;  %4609 = vmatprep.subr.bf16.mxu1 %v5301_v2  ;;  %v3300_v5 = vpack.c.bf16 %v3296_v16, %v3296_v16  ;;  %v3429_v1 = vld [vmem:[#allocation10] sm:$0x7] }
 0x523   :  { %v3286_v11 = vrot.slane %v3278_v17, 7  ;;  %v3442_v2 = vrot.slane %v3429_v1, %v5731_v34 }
 0x524   :  { %4031 = vmatprep.mubr.bf16.mxu0 %v3300_v5  ;;  %4112 = vmatprep.mubr.bf16.mxu1 %v3300_v5 }
 0x525   :  { %4002 = vmatpush1.bf16.msra.mxu0 %v5298_v15  ;;  %4610 = vmatpush3.bf16.msra.mxu1 %v5302_v50  ;;  %v3295_v18 = vsel %vm3292_vm3, %v3274_v10, %v3286_v11  ;;  %v5544_v50 = vmov 1983009808   ;;  %v3438_v10 = vrot.slane %v3429_v1, %v5685_v32 }
 0x526   :  { %4003 = vmatprep.subr.bf16.mxu0 %v5305_v7  ;;  %4611 = vmatprep.subr.bf16.mxu1 %v5306_v8  ;;  %v3299_v46 = vpack.c.bf16 %v3295_v18, %v3295_v18  ;;  %v4125_v5 = vunpack.c.l.s4 %v5544_v50  ;;  %v3434_v7 = vrot.slane %v3429_v1, %v5680_v30 }
 0x528   :  { %v4126_v8 = vunpack.c.0.s8 %v4125_v5 }
 0x529   :  { %4004 = vmatpush1.bf16.msra.mxu0 %v5303_v13  ;;  %4612 = vmatpush3.bf16.msra.mxu1 %v5307_v14 }
 0x52a   :  { %4005 = vmatprep.subr.bf16.mxu0 %v5310_v20  ;;  %4613 = vmatprep.subr.bf16.mxu1 %v5311_v24  ;;  %v4129_v18 = vsub.s32 %v4126_v8, %v5677_v27 }
 0x52d   :  { %4006 = vmatpush1.bf16.msra.mxu0 %v5308_v26  ;;  %4614 = vmatpush3.bf16.msra.mxu1 %v5312_v12 }
 0x52e   :  { %4007 = vmatprep.subr.bf16.mxu0 %v5315_v6  ;;  %4615 = vmatprep.subr.bf16.mxu1 %v5316_v25 }
 0x531   :  { %4008 = vmatpush1.bf16.msra.mxu0 %v5313_v28  ;;  %4616 = vmatpush3.bf16.msra.mxu1 %v5317_v9 }
 0x532   :  { %4009 = vmatprep.subr.bf16.mxu0 %v5320_v29  ;;  %4617 = vmatprep.subr.bf16.mxu1 %v5321_v33 }
 0x535   :  { %4010 = vmatpush1.bf16.msra.mxu0 %v5318_v23  ;;  %4618 = vmatpush3.bf16.msra.mxu1 %v5322_v36 }
 0x536   :  { %4011 = vmatprep.subr.bf16.mxu0 %v5325_v37  ;;  %4619 = vmatprep.subr.bf16.mxu1 %v5326_v21 }
 0x539   :  { %4012 = vmatpush1.bf16.msra.mxu0 %v5323_v39  ;;  %4620 = vmatpush3.bf16.msra.mxu1 %v5327_v41 }
 0x53a   :  { %4013 = vmatprep.subr.bf16.mxu0 %v5330_v42  ;;  %4621 = vmatprep.subr.bf16.mxu1 %v5331_v43 }
 0x53d   :  { %4014 = vmatpush1.bf16.msra.mxu0 %v5328_v19  ;;  %4622 = vmatpush3.bf16.msra.mxu1 %v5332_v44 }
 0x53e   :  { %4015 = vmatprep.subr.bf16.mxu0 %v5335_v40 }
 0x540   :  { %4113 = vmatmul.mubr.bf16.vlgmr.msra.gmra.mrb[52].mxu1 %v3299_v46 }
 0x541   :  { %4016 = vmatpush1.bf16.msra.mxu0 %v5333_v45 }
 0x542   :  { %4017 = vmatprep.subr.bf16.mxu0 %v5338_v38 }
 0x545   :  { %4018 = vmatpush1.bf16.msra.mxu0 %v5336_v47 }
 0x546   :  { %4019 = vmatprep.subr.bf16.mxu0 %v5341_v49 }
 0x549   :  { %4020 = vmatpush1.bf16.msra.mxu0 %v5339_v48 }
 0x54a   :  { %4021 = vmatprep.subr.bf16.mxu0 %v5344_v52 }
 0x54d   :  { %4022 = vmatpush1.bf16.msra.mxu0 %v5342_v22 }
 0x54e   :  { %4023 = vmatprep.subr.bf16.mxu0 %v5347_v53 }
 0x551   :  { %4024 = vmatpush1.bf16.msra.mxu0 %v5345_v35 }
 0x552   :  { %4025 = vmatprep.subr.bf16.mxu0 %v5350_v57 }
 0x555   :  { %4026 = vmatpush1.bf16.msra.mxu0 %v5348_v31 }
 0x556   :  { %4027 = vmatprep.subr.bf16.mxu0 %v5353_v58 }
 0x559   :  { %4028 = vmatpush1.bf16.msra.mxu0 %v5351_v59 }
 0x55a   :  { %4029 = vmatprep.subr.bf16.mxu0 %v5356_v60 }
 0x55d   :  { %4030 = vmatpush1.bf16.msra.mxu0 %v5354_v61 }
 0x560   :  { %4032 = vmatmul.mubr.bf16.vlgmr.msra.gmra.mrb[44].mxu0 %v3299_v46 }
 0x5f3   :  { %v4601_v62 = vpop.f32.mrb[48].mxu1 }
 0x5f4   :  { %v4602_v51 = vpop.f32.mrb[49].mxu1 }
 0x5f5   :  { %v4603_v63 = vadd.f32 %v4602_v51, %v4601_v62  ;;  %v4604_v55 = vpop.f32.mrb[50].mxu1 }
 0x5f6   :  { %v4605_v56 = vpop.f32.mrb[51].mxu1 }
 0x5f7   :  { %v4075_v4 = vadd.f32 %v4603_v63, %v3442_v2 }
 0x613   :  { %v4623_v3 = vpop.f32.mrb[52].mxu1 }
 0x614   :  { %v4624_v54 = vpop.f32.mrb[53].mxu1 }
 0x615   :  { %v4625_v0 = vadd.f32 %v4624_v54, %v4623_v3  ;;  %v4626_v17 = vpop.f32.mrb[54].mxu1 }
 0x616   :  { %v4627_v15 = vpop.f32.mrb[55].mxu1 }
 0x617   :  { %v4115_v16 = vadd.f32 %v4625_v0, %v4075_v4 }
 0x619   :  { %v4137_v12 = vrot.slane %v4115_v16, %v4129_v18 }
 0x633   :  { %v4033_v11 = vpop.f32.mrb[44].mxu0 }
 0x634   :  { %v4753_v13 = vadd.f32 %v4033_v11, %v3434_v7  ;;  %v4035_v14 = vpop.f32.mrb[45].mxu0 }
 0x635   :  { %v4754_v34 = vadd.f32 %v4035_v14, %v3438_v10  ;;  %v4037_v20 = vpop.f32.mrb[46].mxu0 }
 0x636   :  { %v4038_v24 = vpop.f32.mrb[47].mxu0 }
 0x637   :  { %v4123_v26 = vcombine.low %v4753_v13, %v4754_v34 }
 0x639   :  { %v4130_v6 = vrot.slane %v4123_v26, %v4129_v18 }
 0x63b   :  { %v4138_v25 = vcombine.low %v4130_v6, %v4137_v12 }
 0x63d   :  { %4140 = vst [vmem:[#allocation11] sm:$0x3f] %v4138_v25 }
 0x63e   :  { %5513 = shalt.err (!%p5510_p2)
}
 0x63f   :  { %s5514_s6 = scalar_lea.hbm %s5890_s5, 96 }
 0x640   :  { %p5515_p3 = scmp.ne.s32.totalorder %s5890_s5, %s5514_s6  ;;  %p5518_p4 = scmp.lt.u32.totalorder %s5514_s6, %s5890_s5 }
 0x642   :  { %p5520_p5 = pnand %p5518_p4, %p5515_p3 }
 0x644   :  { %5523 = shalt.err (!%p5520_p5)
}
 0x645   :  { %4150 = dma.vmem_to_hbm [thread:$0]  %s4148_s28, 96, %s5890_s5, [#allocation4]  }
 0x646   :  { %5530 = dma.done.wait [#allocation4], 96  }
 0x647   :  { %5531 = vsyncadd [#allocation4], 4294967200 }
 0x648   :  { %4154 = vsyncpa [#allocation3], 1 }
 0x649   :  { %4155 = vsyncpa [#allocation6], 1 }
 0x64a   :  { %4156 = vsyncpa [#allocation9], 1 }
 0x64b   :  { %4157 = vsyncpa [#allocation4], 1 }

</bundles_post_ra>
